<compile_context>
chip_gen: v5e
topology: v5e:2x2
jax: 0.10.0
libtpu: 0.0.40
codegen_flags: <defaults>
</compile_context>

<pallas_src>
import functools

import jax
import jax.numpy as jnp
from jax.experimental import pallas as pl
from jax.experimental.pallas import tpu as pltpu


def _round_up(a, m):
    return ((a + m - 1) // m) * m


def _spatial_attention_kernel(x_ref, w_ref, b_ref, o_ref,
                              pad_ref, mx_ref, sm_ref, *, K, C):
    # x_ref : (1, c_tile, H, W)  VMEM (one channel tile of one batch element)
    # w_ref : (2*K*K,)           SMEM (flattened conv weight, channel order [max, avg])
    # b_ref : (1,)               SMEM
    # o_ref : (1, 1, H, W)       VMEM
    # pad_ref:(2, Hp, Wp)        VMEM scratch, lane-aligned padded max/avg maps
    # mx_ref, sm_ref: (H, W) f32 VMEM scratch, running channel max / sum
    c_tile = x_ref.shape[1]
    H = x_ref.shape[2]
    W = x_ref.shape[3]
    Hp = pad_ref.shape[1]
    Wp = pad_ref.shape[2]
    P = K // 2
    exact = (C % c_tile == 0)            # static: no partial channel tile

    c_idx = pl.program_id(1)
    n_c = pl.num_programs(1)

    # ---- init running max / sum at the first channel tile of each batch element.
    @pl.when(c_idx == 0)
    def _():
        mx_ref[...] = jnp.full_like(mx_ref, -jnp.inf)
        sm_ref[...] = jnp.zeros_like(sm_ref)

    # ---- fused single-pass channel reduction over this tile (one load per channel).
    base = c_idx * c_tile
    m = mx_ref[...]
    s = sm_ref[...]
    for i in range(c_tile):
        xc = x_ref[0, i].astype(jnp.float32)            # (H, W)
        if exact:
            m = jnp.maximum(m, xc)
            s = s + xc
        else:
            valid = (base + i) < C                      # mask channels past C
            m = jnp.maximum(m, jnp.where(valid, xc, -jnp.inf))
            s = s + jnp.where(valid, xc, 0.0)
    mx_ref[...] = m
    sm_ref[...] = s

    # ---- on the last channel tile: pad, KxK conv (2->1 ch), sigmoid, store.
    @pl.when(c_idx == n_c - 1)
    def _():
        max_map = m
        avg_map = s * (1.0 / C)

        def full_width(mp):
            # One lane-dense (H, Wp) row block: [P zeros | map | right zeros].
            pieces = []
            if P > 0:
                pieces.append(jnp.zeros((H, P), jnp.float32))
            pieces.append(mp)
            if Wp - P - W > 0:
                pieces.append(jnp.zeros((H, Wp - P - W), jnp.float32))
            return pieces[0] if len(pieces) == 1 else jnp.concatenate(pieces, axis=-1)

        for c, mp in ((0, max_map), (1, avg_map)):
            if P > 0:                                   # top halo rows
                pad_ref[c, pl.ds(0, P), :] = jnp.zeros((P, Wp), jnp.float32)
            if Hp - P - H > 0:                          # bottom halo + row padding
                pad_ref[c, pl.ds(P + H, Hp - P - H), :] = (
                    jnp.zeros((Hp - P - H, Wp), jnp.float32))
            pad_ref[c, pl.ds(P, H), :] = full_width(mp)  # interior rows, full width

        # Conv: one aligned (H, Wp) full-width load per (channel, kh); kw taps are
        # static in-register lane slices; accumulate on the VPU.
        acc = jnp.full((H, W), b_ref[0], dtype=jnp.float32)
        for c in range(2):
            for kh in range(K):
                slab = pad_ref[c, pl.ds(kh, H), :]       # (H, Wp)
                for kw in range(K):
                    wv = w_ref[c * K * K + kh * K + kw]
                    acc = acc + wv * slab[:, kw:kw + W]

        o_ref[0, 0, :, :] = jax.nn.sigmoid(acc).astype(o_ref.dtype)


def spatial_attention(x, weight, bias, *, c_tile=None,
                      vmem_budget_bytes=8 * 1024 * 1024):
    """x: (N, C, H, W); weight: (1, 2, K, K); bias: (1,). Returns (N, 1, H, W)."""
    N, C, H, W = x.shape
    K = weight.shape[-1]
    Hp = _round_up(H + K - 1, 8)
    Wp = _round_up(W + K - 1, 128)

    if c_tile is None:
        # VMEM-resident footprint of one channel plane (lane/sublane padded),
        # double-buffered by the BlockSpec pipeline.
        plane_bytes = _round_up(H, 8) * _round_up(W, 128) * x.dtype.itemsize
        c_tile = max(1, vmem_budget_bytes // (2 * plane_bytes))
        c_tile = int(min(c_tile, C, 128))   # cap unroll length / compile time
    n_c = -(-C // c_tile)

    w_flat = weight.reshape(-1).astype(jnp.float32)     # (2*K*K,), ch0=max, ch1=avg
    b = bias.reshape(-1).astype(jnp.float32)            # (1,)

    kernel = functools.partial(_spatial_attention_kernel, K=K, C=C)

    return pl.pallas_call(
        kernel,
        out_shape=jax.ShapeDtypeStruct((N, 1, H, W), x.dtype),
        grid_spec=pltpu.PrefetchScalarGridSpec(
            num_scalar_prefetch=0,
            grid=(N, n_c),
            in_specs=[
                pl.BlockSpec((1, c_tile, H, W), lambda n, c: (n, c, 0, 0)),
                pl.BlockSpec(memory_space=pltpu.SMEM),   # conv weight (scalars)
                pl.BlockSpec(memory_space=pltpu.SMEM),   # conv bias
            ],
            out_specs=pl.BlockSpec((1, 1, H, W), lambda n, c: (n, 0, 0, 0)),
            scratch_shapes=[
                pltpu.VMEM((2, Hp, Wp), jnp.float32),    # padded max/avg maps
                pltpu.VMEM((H, W), jnp.float32),         # running channel max
                pltpu.VMEM((H, W), jnp.float32),         # running channel sum
            ],
        ),
        compiler_params=pltpu.CompilerParams(
            dimension_semantics=("parallel", "arbitrary"),
            vmem_limit_bytes=64 * 1024 * 1024,
        ),
    )(x, w_flat, b)


def _reference(x, weight, bias):
    """Pure-JAX reference matching the PyTorch forward (max first, then avg)."""
    max_map = jnp.max(x, axis=1, keepdims=True)
    avg_map = jnp.mean(x, axis=1, keepdims=True)
    stacked = jnp.concatenate([max_map, avg_map], axis=1)   # (N, 2, H, W)
    K = weight.shape[-1]
    out = jax.lax.conv_general_dilated(
        stacked, weight,
        window_strides=(1, 1),
        padding=[(K // 2, K // 2), (K // 2, K // 2)],
        dimension_numbers=("NCHW", "OIHW", "NCHW"),
    ) + bias.reshape(1, -1, 1, 1)
    return jax.nn.sigmoid(out)


if __name__ == "__main__":
    key = jax.random.PRNGKey(0)
    kx, kw, kb = jax.random.split(key, 3)

    N, C, H, W = 2, 4, 16, 16
    K = 7

    x = jax.random.normal(kx, (N, C, H, W), dtype=jnp.float32)
    # Deterministic synthetic Conv2d(2, 1, 7, padding=3) parameters.
    fan_in = 2 * K * K
    bound = 1.0 / (fan_in ** 0.5)
    weight = jax.random.uniform(kw, (1, 2, K, K), jnp.float32, -bound, bound)
    bias = jax.random.uniform(kb, (1,), jnp.float32, -bound, bound)

    out = spatial_attention(x, weight, bias)
    out = jax.block_until_ready(out)

    ref = _reference(x, weight, bias)
    assert out.shape == (N, 1, H, W), out.shape
    assert jnp.allclose(out, ref, atol=1e-5, rtol=1e-5), float(jnp.max(jnp.abs(out - ref)))

    print("KERNEL_OK")
</pallas_src>

<mosaic_0001>
module attributes {stable_mosaic.version = 11 : i64} {
  func.func @_spatial_attention_kernel(%arg0: i32, %arg1: i32, %arg2: memref<1x4x16x16xf32, #tpu.memory_space<vmem>>, %arg3: memref<98xf32, #tpu.memory_space<smem>>, %arg4: memref<1xf32, #tpu.memory_space<smem>>, %arg5: memref<1x1x16x16xf32, #tpu.memory_space<vmem>>, %arg6: memref<2x24x128xf32, #tpu.memory_space<vmem>>, %arg7: memref<16x16xf32, #tpu.memory_space<vmem>>, %arg8: memref<16x16xf32, #tpu.memory_space<vmem>>) attributes {dimension_semantics = [#tpu.dimension_semantics<parallel>, #tpu.dimension_semantics<arbitrary>], iteration_bounds = array<i64: 2, 1>, scalar_prefetch = 0 : i64, scratch_operands = 3 : i64, tpu.core_type = #tpu.core_type<tc>, window_params = [{transform_indices = @transform_0, window_bounds = array<i64: 1, 4, 16, 16>}, {transform_indices = @transform_1, window_bounds = array<i64: 98>}, {transform_indices = @transform_2, window_bounds = array<i64: 1>}, {transform_indices = @transform_3, window_bounds = array<i64: 1, 1, 16, 16>}]} {
    %c0_i32 = arith.constant 0 : i32
    %0 = arith.cmpi eq, %arg1, %c0_i32 : i32
    %1 = arith.extui %0 : i1 to i32
    %c0_i32_0 = arith.constant 0 : i32
    %2 = arith.cmpi ne, %1, %c0_i32_0 : i32
    scf.if %2 {
      %cst = arith.constant 0xFF800000 : f32
      %26 = vector.broadcast %cst : f32 to vector<16x16xf32>
      %c0_23 = arith.constant 0 : index
      %c0_24 = arith.constant 0 : index
      %27 = vector.load %arg7[%c0_23, %c0_24] : memref<16x16xf32, #tpu.memory_space<vmem>>, vector<16x16xf32>
      tpu.vector_store %arg7[%c0_23, %c0_24], %26 {strides = array<i32>} : memref<16x16xf32, #tpu.memory_space<vmem>>, vector<16x16xf32>,
      %cst_25 = arith.constant 0.000000e+00 : f32
      %28 = vector.broadcast %cst_25 : f32 to vector<16x16xf32>
      %c0_26 = arith.constant 0 : index
      %c0_27 = arith.constant 0 : index
      %29 = vector.load %arg8[%c0_26, %c0_27] : memref<16x16xf32, #tpu.memory_space<vmem>>, vector<16x16xf32>
      tpu.vector_store %arg8[%c0_26, %c0_27], %28 {strides = array<i32>} : memref<16x16xf32, #tpu.memory_space<vmem>>, vector<16x16xf32>,
    } else {
    }
    %c0 = arith.constant 0 : index
    %c0_1 = arith.constant 0 : index
    %3 = vector.load %arg7[%c0, %c0_1] : memref<16x16xf32, #tpu.memory_space<vmem>>, vector<16x16xf32>
    %c0_2 = arith.constant 0 : index
    %c0_3 = arith.constant 0 : index
    %4 = vector.load %arg8[%c0_2, %c0_3] : memref<16x16xf32, #tpu.memory_space<vmem>>, vector<16x16xf32>
    %c0_4 = arith.constant 0 : index
    %c0_5 = arith.constant 0 : index
    %c0_6 = arith.constant 0 : index
    %c0_7 = arith.constant 0 : index
    %5 = vector.load %arg2[%c0_4, %c0_5, %c0_6, %c0_7] : memref<1x4x16x16xf32, #tpu.memory_space<vmem>>, vector<1x1x16x16xf32>
    %6 = vector.shape_cast %5 : vector<1x1x16x16xf32> to vector<16x16xf32>
    %7 = arith.maximumf %3, %6 : vector<16x16xf32>
    %8 = arith.addf %4, %6 : vector<16x16xf32>
    %c0_8 = arith.constant 0 : index
    %c1 = arith.constant 1 : index
    %c0_9 = arith.constant 0 : index
    %c0_10 = arith.constant 0 : index
    %9 = vector.load %arg2[%c0_8, %c1, %c0_9, %c0_10] : memref<1x4x16x16xf32, #tpu.memory_space<vmem>>, vector<1x1x16x16xf32>
    %10 = vector.shape_cast %9 : vector<1x1x16x16xf32> to vector<16x16xf32>
    %11 = arith.maximumf %7, %10 : vector<16x16xf32>
    %12 = arith.addf %8, %10 : vector<16x16xf32>
    %c0_11 = arith.constant 0 : index
    %c2 = arith.constant 2 : index
    %c0_12 = arith.constant 0 : index
    %c0_13 = arith.constant 0 : index
    %13 = vector.load %arg2[%c0_11, %c2, %c0_12, %c0_13] : memref<1x4x16x16xf32, #tpu.memory_space<vmem>>, vector<1x1x16x16xf32>
    %14 = vector.shape_cast %13 : vector<1x1x16x16xf32> to vector<16x16xf32>
    %15 = arith.maximumf %11, %14 : vector<16x16xf32>
    %16 = arith.addf %12, %14 : vector<16x16xf32>
    %c0_14 = arith.constant 0 : index
    %c3 = arith.constant 3 : index
    %c0_15 = arith.constant 0 : index
    %c0_16 = arith.constant 0 : index
    %17 = vector.load %arg2[%c0_14, %c3, %c0_15, %c0_16] : memref<1x4x16x16xf32, #tpu.memory_space<vmem>>, vector<1x1x16x16xf32>
    %18 = vector.shape_cast %17 : vector<1x1x16x16xf32> to vector<16x16xf32>
    %19 = arith.maximumf %15, %18 : vector<16x16xf32>
    %20 = arith.addf %16, %18 : vector<16x16xf32>
    %c0_17 = arith.constant 0 : index
    %c0_18 = arith.constant 0 : index
    %21 = vector.load %arg7[%c0_17, %c0_18] : memref<16x16xf32, #tpu.memory_space<vmem>>, vector<16x16xf32>
    tpu.vector_store %arg7[%c0_17, %c0_18], %19 {strides = array<i32>} : memref<16x16xf32, #tpu.memory_space<vmem>>, vector<16x16xf32>,
    %c0_19 = arith.constant 0 : index
    %c0_20 = arith.constant 0 : index
    %22 = vector.load %arg8[%c0_19, %c0_20] : memref<16x16xf32, #tpu.memory_space<vmem>>, vector<16x16xf32>
    tpu.vector_store %arg8[%c0_19, %c0_20], %20 {strides = array<i32>} : memref<16x16xf32, #tpu.memory_space<vmem>>, vector<16x16xf32>,
    %c0_i32_21 = arith.constant 0 : i32
    %23 = arith.cmpi eq, %arg1, %c0_i32_21 : i32
    %24 = arith.extui %23 : i1 to i32
    %c0_i32_22 = arith.constant 0 : i32
    %25 = arith.cmpi ne, %24, %c0_i32_22 : i32
    scf.if %25 {
      %cst = arith.constant 2.500000e-01 : f32
      %26 = vector.broadcast %cst : f32 to vector<16x16xf32>
      %27 = arith.mulf %20, %26 : vector<16x16xf32>
      %cst_23 = arith.constant 0.000000e+00 : f32
      %28 = vector.broadcast %cst_23 : f32 to vector<3x128xf32>
      %c0_24 = arith.constant 0 : index
      %c0_25 = arith.constant 0 : index
      %c0_26 = arith.constant 0 : index
      %29 = vector.load %arg6[%c0_24, %c0_25, %c0_26] : memref<2x24x128xf32, #tpu.memory_space<vmem>>, vector<1x3x128xf32>
      %30 = vector.shape_cast %29 : vector<1x3x128xf32> to vector<3x128xf32>
      %31 = vector.shape_cast %28 : vector<3x128xf32> to vector<1x3x128xf32>
      tpu.vector_store %arg6[%c0_24, %c0_25, %c0_26], %31 {strides = array<i32>} : memref<2x24x128xf32, #tpu.memory_space<vmem>>, vector<1x3x128xf32>,
      %cst_27 = arith.constant 0.000000e+00 : f32
      %32 = vector.broadcast %cst_27 : f32 to vector<5x128xf32>
      %c0_28 = arith.constant 0 : index
      %c19 = arith.constant 19 : index
      %c0_29 = arith.constant 0 : index
      %33 = vector.load %arg6[%c0_28, %c19, %c0_29] : memref<2x24x128xf32, #tpu.memory_space<vmem>>, vector<1x5x128xf32>
      %34 = vector.shape_cast %33 : vector<1x5x128xf32> to vector<5x128xf32>
      %35 = vector.shape_cast %32 : vector<5x128xf32> to vector<1x5x128xf32>
      tpu.vector_store %arg6[%c0_28, %c19, %c0_29], %35 {strides = array<i32>} : memref<2x24x128xf32, #tpu.memory_space<vmem>>, vector<1x5x128xf32>,
      %cst_30 = arith.constant 0.000000e+00 : f32
      %36 = vector.broadcast %cst_30 : f32 to vector<16x3xf32>
      %cst_31 = arith.constant 0.000000e+00 : f32
      %37 = vector.broadcast %cst_31 : f32 to vector<16x109xf32>
      %38 = tpu.concatenate %36, %19, %37 in 1 : vector<16x3xf32>, vector<16x16xf32>, vector<16x109xf32> -> vector<16x128xf32>
      %c0_32 = arith.constant 0 : index
      %c3_33 = arith.constant 3 : index
      %c0_34 = arith.constant 0 : index
      %39 = vector.load %arg6[%c0_32, %c3_33, %c0_34] : memref<2x24x128xf32, #tpu.memory_space<vmem>>, vector<1x16x128xf32>
      %40 = vector.shape_cast %39 : vector<1x16x128xf32> to vector<16x128xf32>
      %41 = vector.shape_cast %38 : vector<16x128xf32> to vector<1x16x128xf32>
      tpu.vector_store %arg6[%c0_32, %c3_33, %c0_34], %41 {strides = array<i32>} : memref<2x24x128xf32, #tpu.memory_space<vmem>>, vector<1x16x128xf32>,
      %cst_35 = arith.constant 0.000000e+00 : f32
      %42 = vector.broadcast %cst_35 : f32 to vector<3x128xf32>
      %c1_36 = arith.constant 1 : index
      %c0_37 = arith.constant 0 : index
      %c0_38 = arith.constant 0 : index
      %43 = vector.load %arg6[%c1_36, %c0_37, %c0_38] : memref<2x24x128xf32, #tpu.memory_space<vmem>>, vector<1x3x128xf32>
      %44 = vector.shape_cast %43 : vector<1x3x128xf32> to vector<3x128xf32>
      %45 = vector.shape_cast %42 : vector<3x128xf32> to vector<1x3x128xf32>
      tpu.vector_store %arg6[%c1_36, %c0_37, %c0_38], %45 {strides = array<i32>} : memref<2x24x128xf32, #tpu.memory_space<vmem>>, vector<1x3x128xf32>,
      %cst_39 = arith.constant 0.000000e+00 : f32
      %46 = vector.broadcast %cst_39 : f32 to vector<5x128xf32>
      %c1_40 = arith.constant 1 : index
      %c19_41 = arith.constant 19 : index
      %c0_42 = arith.constant 0 : index
      %47 = vector.load %arg6[%c1_40, %c19_41, %c0_42] : memref<2x24x128xf32, #tpu.memory_space<vmem>>, vector<1x5x128xf32>
      %48 = vector.shape_cast %47 : vector<1x5x128xf32> to vector<5x128xf32>
      %49 = vector.shape_cast %46 : vector<5x128xf32> to vector<1x5x128xf32>
      tpu.vector_store %arg6[%c1_40, %c19_41, %c0_42], %49 {strides = array<i32>} : memref<2x24x128xf32, #tpu.memory_space<vmem>>, vector<1x5x128xf32>,
      %cst_43 = arith.constant 0.000000e+00 : f32
      %50 = vector.broadcast %cst_43 : f32 to vector<16x3xf32>
      %cst_44 = arith.constant 0.000000e+00 : f32
      %51 = vector.broadcast %cst_44 : f32 to vector<16x109xf32>
      %52 = tpu.concatenate %50, %27, %51 in 1 : vector<16x3xf32>, vector<16x16xf32>, vector<16x109xf32> -> vector<16x128xf32>
      %c1_45 = arith.constant 1 : index
      %c3_46 = arith.constant 3 : index
      %c0_47 = arith.constant 0 : index
      %53 = vector.load %arg6[%c1_45, %c3_46, %c0_47] : memref<2x24x128xf32, #tpu.memory_space<vmem>>, vector<1x16x128xf32>
      %54 = vector.shape_cast %53 : vector<1x16x128xf32> to vector<16x128xf32>
      %55 = vector.shape_cast %52 : vector<16x128xf32> to vector<1x16x128xf32>
      tpu.vector_store %arg6[%c1_45, %c3_46, %c0_47], %55 {strides = array<i32>} : memref<2x24x128xf32, #tpu.memory_space<vmem>>, vector<1x16x128xf32>,
      %c0_48 = arith.constant 0 : index
      %56 = memref.load %arg4[%c0_48] : memref<1xf32, #tpu.memory_space<smem>>
      %57 = vector.broadcast %56 : f32 to vector<16x16xf32>
      %c0_49 = arith.constant 0 : index
      %c0_50 = arith.constant 0 : index
      %c0_51 = arith.constant 0 : index
      %58 = vector.load %arg6[%c0_49, %c0_50, %c0_51] : memref<2x24x128xf32, #tpu.memory_space<vmem>>, vector<1x16x128xf32>
      %59 = vector.shape_cast %58 : vector<1x16x128xf32> to vector<16x128xf32>
      %c0_52 = arith.constant 0 : index
      %60 = memref.load %arg3[%c0_52] : memref<98xf32, #tpu.memory_space<smem>>
      %61 = vector.extract_strided_slice %59 {offsets = [0, 0], sizes = [16, 16], strides = [1, 1]} : vector<16x128xf32> to vector<16x16xf32>
      %62 = vector.broadcast %60 : f32 to vector<16x16xf32>
      %63 = arith.mulf %62, %61 : vector<16x16xf32>
      %64 = arith.addf %57, %63 : vector<16x16xf32>
      %c1_53 = arith.constant 1 : index
      %65 = memref.load %arg3[%c1_53] : memref<98xf32, #tpu.memory_space<smem>>
      %66 = vector.extract_strided_slice %59 {offsets = [0, 1], sizes = [16, 16], strides = [1, 1]} : vector<16x128xf32> to vector<16x16xf32>
      %67 = vector.broadcast %65 : f32 to vector<16x16xf32>
      %68 = arith.mulf %67, %66 : vector<16x16xf32>
      %69 = arith.addf %64, %68 : vector<16x16xf32>
      %c2_54 = arith.constant 2 : index
      %70 = memref.load %arg3[%c2_54] : memref<98xf32, #tpu.memory_space<smem>>
      %71 = vector.extract_strided_slice %59 {offsets = [0, 2], sizes = [16, 16], strides = [1, 1]} : vector<16x128xf32> to vector<16x16xf32>
      %72 = vector.broadcast %70 : f32 to vector<16x16xf32>
      %73 = arith.mulf %72, %71 : vector<16x16xf32>
      %74 = arith.addf %69, %73 : vector<16x16xf32>
      %c3_55 = arith.constant 3 : index
      %75 = memref.load %arg3[%c3_55] : memref<98xf32, #tpu.memory_space<smem>>
      %76 = vector.extract_strided_slice %59 {offsets = [0, 3], sizes = [16, 16], strides = [1, 1]} : vector<16x128xf32> to vector<16x16xf32>
      %77 = vector.broadcast %75 : f32 to vector<16x16xf32>
      %78 = arith.mulf %77, %76 : vector<16x16xf32>
      %79 = arith.addf %74, %78 : vector<16x16xf32>
      %c4 = arith.constant 4 : index
      %80 = memref.load %arg3[%c4] : memref<98xf32, #tpu.memory_space<smem>>
      %81 = vector.extract_strided_slice %59 {offsets = [0, 4], sizes = [16, 16], strides = [1, 1]} : vector<16x128xf32> to vector<16x16xf32>
      %82 = vector.broadcast %80 : f32 to vector<16x16xf32>
      %83 = arith.mulf %82, %81 : vector<16x16xf32>
      %84 = arith.addf %79, %83 : vector<16x16xf32>
      %c5 = arith.constant 5 : index
      %85 = memref.load %arg3[%c5] : memref<98xf32, #tpu.memory_space<smem>>
      %86 = vector.extract_strided_slice %59 {offsets = [0, 5], sizes = [16, 16], strides = [1, 1]} : vector<16x128xf32> to vector<16x16xf32>
      %87 = vector.broadcast %85 : f32 to vector<16x16xf32>
      %88 = arith.mulf %87, %86 : vector<16x16xf32>
      %89 = arith.addf %84, %88 : vector<16x16xf32>
      %c6 = arith.constant 6 : index
      %90 = memref.load %arg3[%c6] : memref<98xf32, #tpu.memory_space<smem>>
      %91 = vector.extract_strided_slice %59 {offsets = [0, 6], sizes = [16, 16], strides = [1, 1]} : vector<16x128xf32> to vector<16x16xf32>
      %92 = vector.broadcast %90 : f32 to vector<16x16xf32>
      %93 = arith.mulf %92, %91 : vector<16x16xf32>
      %94 = arith.addf %89, %93 : vector<16x16xf32>
      %c0_56 = arith.constant 0 : index
      %c1_57 = arith.constant 1 : index
      %c0_58 = arith.constant 0 : index
      %95 = vector.load %arg6[%c0_56, %c1_57, %c0_58] : memref<2x24x128xf32, #tpu.memory_space<vmem>>, vector<1x16x128xf32>
      %96 = vector.shape_cast %95 : vector<1x16x128xf32> to vector<16x128xf32>
      %c7 = arith.constant 7 : index
      %97 = memref.load %arg3[%c7] : memref<98xf32, #tpu.memory_space<smem>>
      %98 = vector.extract_strided_slice %96 {offsets = [0, 0], sizes = [16, 16], strides = [1, 1]} : vector<16x128xf32> to vector<16x16xf32>
      %99 = vector.broadcast %97 : f32 to vector<16x16xf32>
      %100 = arith.mulf %99, %98 : vector<16x16xf32>
      %101 = arith.addf %94, %100 : vector<16x16xf32>
      %c8 = arith.constant 8 : index
      %102 = memref.load %arg3[%c8] : memref<98xf32, #tpu.memory_space<smem>>
      %103 = vector.extract_strided_slice %96 {offsets = [0, 1], sizes = [16, 16], strides = [1, 1]} : vector<16x128xf32> to vector<16x16xf32>
      %104 = vector.broadcast %102 : f32 to vector<16x16xf32>
      %105 = arith.mulf %104, %103 : vector<16x16xf32>
      %106 = arith.addf %101, %105 : vector<16x16xf32>
      %c9 = arith.constant 9 : index
      %107 = memref.load %arg3[%c9] : memref<98xf32, #tpu.memory_space<smem>>
      %108 = vector.extract_strided_slice %96 {offsets = [0, 2], sizes = [16, 16], strides = [1, 1]} : vector<16x128xf32> to vector<16x16xf32>
      %109 = vector.broadcast %107 : f32 to vector<16x16xf32>
      %110 = arith.mulf %109, %108 : vector<16x16xf32>
      %111 = arith.addf %106, %110 : vector<16x16xf32>
      %c10 = arith.constant 10 : index
      %112 = memref.load %arg3[%c10] : memref<98xf32, #tpu.memory_space<smem>>
      %113 = vector.extract_strided_slice %96 {offsets = [0, 3], sizes = [16, 16], strides = [1, 1]} : vector<16x128xf32> to vector<16x16xf32>
      %114 = vector.broadcast %112 : f32 to vector<16x16xf32>
      %115 = arith.mulf %114, %113 : vector<16x16xf32>
      %116 = arith.addf %111, %115 : vector<16x16xf32>
      %c11 = arith.constant 11 : index
      %117 = memref.load %arg3[%c11] : memref<98xf32, #tpu.memory_space<smem>>
      %118 = vector.extract_strided_slice %96 {offsets = [0, 4], sizes = [16, 16], strides = [1, 1]} : vector<16x128xf32> to vector<16x16xf32>
      %119 = vector.broadcast %117 : f32 to vector<16x16xf32>
      %120 = arith.mulf %119, %118 : vector<16x16xf32>
      %121 = arith.addf %116, %120 : vector<16x16xf32>
      %c12 = arith.constant 12 : index
      %122 = memref.load %arg3[%c12] : memref<98xf32, #tpu.memory_space<smem>>
      %123 = vector.extract_strided_slice %96 {offsets = [0, 5], sizes = [16, 16], strides = [1, 1]} : vector<16x128xf32> to vector<16x16xf32>
      %124 = vector.broadcast %122 : f32 to vector<16x16xf32>
      %125 = arith.mulf %124, %123 : vector<16x16xf32>
      %126 = arith.addf %121, %125 : vector<16x16xf32>
      %c13 = arith.constant 13 : index
      %127 = memref.load %arg3[%c13] : memref<98xf32, #tpu.memory_space<smem>>
      %128 = vector.extract_strided_slice %96 {offsets = [0, 6], sizes = [16, 16], strides = [1, 1]} : vector<16x128xf32> to vector<16x16xf32>
      %129 = vector.broadcast %127 : f32 to vector<16x16xf32>
      %130 = arith.mulf %129, %128 : vector<16x16xf32>
      %131 = arith.addf %126, %130 : vector<16x16xf32>
      %c0_59 = arith.constant 0 : index
      %c2_60 = arith.constant 2 : index
      %c0_61 = arith.constant 0 : index
      %132 = vector.load %arg6[%c0_59, %c2_60, %c0_61] : memref<2x24x128xf32, #tpu.memory_space<vmem>>, vector<1x16x128xf32>
      %133 = vector.shape_cast %132 : vector<1x16x128xf32> to vector<16x128xf32>
      %c14 = arith.constant 14 : index
      %134 = memref.load %arg3[%c14] : memref<98xf32, #tpu.memory_space<smem>>
      %135 = vector.extract_strided_slice %133 {offsets = [0, 0], sizes = [16, 16], strides = [1, 1]} : vector<16x128xf32> to vector<16x16xf32>
      %136 = vector.broadcast %134 : f32 to vector<16x16xf32>
      %137 = arith.mulf %136, %135 : vector<16x16xf32>
      %138 = arith.addf %131, %137 : vector<16x16xf32>
      %c15 = arith.constant 15 : index
      %139 = memref.load %arg3[%c15] : memref<98xf32, #tpu.memory_space<smem>>
      %140 = vector.extract_strided_slice %133 {offsets = [0, 1], sizes = [16, 16], strides = [1, 1]} : vector<16x128xf32> to vector<16x16xf32>
      %141 = vector.broadcast %139 : f32 to vector<16x16xf32>
      %142 = arith.mulf %141, %140 : vector<16x16xf32>
      %143 = arith.addf %138, %142 : vector<16x16xf32>
      %c16 = arith.constant 16 : index
      %144 = memref.load %arg3[%c16] : memref<98xf32, #tpu.memory_space<smem>>
      %145 = vector.extract_strided_slice %133 {offsets = [0, 2], sizes = [16, 16], strides = [1, 1]} : vector<16x128xf32> to vector<16x16xf32>
      %146 = vector.broadcast %144 : f32 to vector<16x16xf32>
      %147 = arith.mulf %146, %145 : vector<16x16xf32>
      %148 = arith.addf %143, %147 : vector<16x16xf32>
      %c17 = arith.constant 17 : index
      %149 = memref.load %arg3[%c17] : memref<98xf32, #tpu.memory_space<smem>>
      %150 = vector.extract_strided_slice %133 {offsets = [0, 3], sizes = [16, 16], strides = [1, 1]} : vector<16x128xf32> to vector<16x16xf32>
      %151 = vector.broadcast %149 : f32 to vector<16x16xf32>
      %152 = arith.mulf %151, %150 : vector<16x16xf32>
      %153 = arith.addf %148, %152 : vector<16x16xf32>
      %c18 = arith.constant 18 : index
      %154 = memref.load %arg3[%c18] : memref<98xf32, #tpu.memory_space<smem>>
      %155 = vector.extract_strided_slice %133 {offsets = [0, 4], sizes = [16, 16], strides = [1, 1]} : vector<16x128xf32> to vector<16x16xf32>
      %156 = vector.broadcast %154 : f32 to vector<16x16xf32>
      %157 = arith.mulf %156, %155 : vector<16x16xf32>
      %158 = arith.addf %153, %157 : vector<16x16xf32>
      %c19_62 = arith.constant 19 : index
      %159 = memref.load %arg3[%c19_62] : memref<98xf32, #tpu.memory_space<smem>>
      %160 = vector.extract_strided_slice %133 {offsets = [0, 5], sizes = [16, 16], strides = [1, 1]} : vector<16x128xf32> to vector<16x16xf32>
      %161 = vector.broadcast %159 : f32 to vector<16x16xf32>
      %162 = arith.mulf %161, %160 : vector<16x16xf32>
      %163 = arith.addf %158, %162 : vector<16x16xf32>
      %c20 = arith.constant 20 : index
      %164 = memref.load %arg3[%c20] : memref<98xf32, #tpu.memory_space<smem>>
      %165 = vector.extract_strided_slice %133 {offsets = [0, 6], sizes = [16, 16], strides = [1, 1]} : vector<16x128xf32> to vector<16x16xf32>
      %166 = vector.broadcast %164 : f32 to vector<16x16xf32>
      %167 = arith.mulf %166, %165 : vector<16x16xf32>
      %168 = arith.addf %163, %167 : vector<16x16xf32>
      %c0_63 = arith.constant 0 : index
      %c3_64 = arith.constant 3 : index
      %c0_65 = arith.constant 0 : index
      %169 = vector.load %arg6[%c0_63, %c3_64, %c0_65] : memref<2x24x128xf32, #tpu.memory_space<vmem>>, vector<1x16x128xf32>
      %170 = vector.shape_cast %169 : vector<1x16x128xf32> to vector<16x128xf32>
      %c21 = arith.constant 21 : index
      %171 = memref.load %arg3[%c21] : memref<98xf32, #tpu.memory_space<smem>>
      %172 = vector.extract_strided_slice %170 {offsets = [0, 0], sizes = [16, 16], strides = [1, 1]} : vector<16x128xf32> to vector<16x16xf32>
      %173 = vector.broadcast %171 : f32 to vector<16x16xf32>
      %174 = arith.mulf %173, %172 : vector<16x16xf32>
      %175 = arith.addf %168, %174 : vector<16x16xf32>
      %c22 = arith.constant 22 : index
      %176 = memref.load %arg3[%c22] : memref<98xf32, #tpu.memory_space<smem>>
      %177 = vector.extract_strided_slice %170 {offsets = [0, 1], sizes = [16, 16], strides = [1, 1]} : vector<16x128xf32> to vector<16x16xf32>
      %178 = vector.broadcast %176 : f32 to vector<16x16xf32>
      %179 = arith.mulf %178, %177 : vector<16x16xf32>
      %180 = arith.addf %175, %179 : vector<16x16xf32>
      %c23 = arith.constant 23 : index
      %181 = memref.load %arg3[%c23] : memref<98xf32, #tpu.memory_space<smem>>
      %182 = vector.extract_strided_slice %170 {offsets = [0, 2], sizes = [16, 16], strides = [1, 1]} : vector<16x128xf32> to vector<16x16xf32>
      %183 = vector.broadcast %181 : f32 to vector<16x16xf32>
      %184 = arith.mulf %183, %182 : vector<16x16xf32>
      %185 = arith.addf %180, %184 : vector<16x16xf32>
      %c24 = arith.constant 24 : index
      %186 = memref.load %arg3[%c24] : memref<98xf32, #tpu.memory_space<smem>>
      %187 = vector.extract_strided_slice %170 {offsets = [0, 3], sizes = [16, 16], strides = [1, 1]} : vector<16x128xf32> to vector<16x16xf32>
      %188 = vector.broadcast %186 : f32 to vector<16x16xf32>
      %189 = arith.mulf %188, %187 : vector<16x16xf32>
      %190 = arith.addf %185, %189 : vector<16x16xf32>
      %c25 = arith.constant 25 : index
      %191 = memref.load %arg3[%c25] : memref<98xf32, #tpu.memory_space<smem>>
      %192 = vector.extract_strided_slice %170 {offsets = [0, 4], sizes = [16, 16], strides = [1, 1]} : vector<16x128xf32> to vector<16x16xf32>
      %193 = vector.broadcast %191 : f32 to vector<16x16xf32>
      %194 = arith.mulf %193, %192 : vector<16x16xf32>
      %195 = arith.addf %190, %194 : vector<16x16xf32>
      %c26 = arith.constant 26 : index
      %196 = memref.load %arg3[%c26] : memref<98xf32, #tpu.memory_space<smem>>
      %197 = vector.extract_strided_slice %170 {offsets = [0, 5], sizes = [16, 16], strides = [1, 1]} : vector<16x128xf32> to vector<16x16xf32>
      %198 = vector.broadcast %196 : f32 to vector<16x16xf32>
      %199 = arith.mulf %198, %197 : vector<16x16xf32>
      %200 = arith.addf %195, %199 : vector<16x16xf32>
      %c27 = arith.constant 27 : index
      %201 = memref.load %arg3[%c27] : memref<98xf32, #tpu.memory_space<smem>>
      %202 = vector.extract_strided_slice %170 {offsets = [0, 6], sizes = [16, 16], strides = [1, 1]} : vector<16x128xf32> to vector<16x16xf32>
      %203 = vector.broadcast %201 : f32 to vector<16x16xf32>
      %204 = arith.mulf %203, %202 : vector<16x16xf32>
      %205 = arith.addf %200, %204 : vector<16x16xf32>
      %c0_66 = arith.constant 0 : index
      %c4_67 = arith.constant 4 : index
      %c0_68 = arith.constant 0 : index
      %206 = vector.load %arg6[%c0_66, %c4_67, %c0_68] : memref<2x24x128xf32, #tpu.memory_space<vmem>>, vector<1x16x128xf32>
      %207 = vector.shape_cast %206 : vector<1x16x128xf32> to vector<16x128xf32>
      %c28 = arith.constant 28 : index
      %208 = memref.load %arg3[%c28] : memref<98xf32, #tpu.memory_space<smem>>
      %209 = vector.extract_strided_slice %207 {offsets = [0, 0], sizes = [16, 16], strides = [1, 1]} : vector<16x128xf32> to vector<16x16xf32>
      %210 = vector.broadcast %208 : f32 to vector<16x16xf32>
      %211 = arith.mulf %210, %209 : vector<16x16xf32>
      %212 = arith.addf %205, %211 : vector<16x16xf32>
      %c29 = arith.constant 29 : index
      %213 = memref.load %arg3[%c29] : memref<98xf32, #tpu.memory_space<smem>>
      %214 = vector.extract_strided_slice %207 {offsets = [0, 1], sizes = [16, 16], strides = [1, 1]} : vector<16x128xf32> to vector<16x16xf32>
      %215 = vector.broadcast %213 : f32 to vector<16x16xf32>
      %216 = arith.mulf %215, %214 : vector<16x16xf32>
      %217 = arith.addf %212, %216 : vector<16x16xf32>
      %c30 = arith.constant 30 : index
      %218 = memref.load %arg3[%c30] : memref<98xf32, #tpu.memory_space<smem>>
      %219 = vector.extract_strided_slice %207 {offsets = [0, 2], sizes = [16, 16], strides = [1, 1]} : vector<16x128xf32> to vector<16x16xf32>
      %220 = vector.broadcast %218 : f32 to vector<16x16xf32>
      %221 = arith.mulf %220, %219 : vector<16x16xf32>
      %222 = arith.addf %217, %221 : vector<16x16xf32>
      %c31 = arith.constant 31 : index
      %223 = memref.load %arg3[%c31] : memref<98xf32, #tpu.memory_space<smem>>
      %224 = vector.extract_strided_slice %207 {offsets = [0, 3], sizes = [16, 16], strides = [1, 1]} : vector<16x128xf32> to vector<16x16xf32>
      %225 = vector.broadcast %223 : f32 to vector<16x16xf32>
      %226 = arith.mulf %225, %224 : vector<16x16xf32>
      %227 = arith.addf %222, %226 : vector<16x16xf32>
      %c32 = arith.constant 32 : index
      %228 = memref.load %arg3[%c32] : memref<98xf32, #tpu.memory_space<smem>>
      %229 = vector.extract_strided_slice %207 {offsets = [0, 4], sizes = [16, 16], strides = [1, 1]} : vector<16x128xf32> to vector<16x16xf32>
      %230 = vector.broadcast %228 : f32 to vector<16x16xf32>
      %231 = arith.mulf %230, %229 : vector<16x16xf32>
      %232 = arith.addf %227, %231 : vector<16x16xf32>
      %c33 = arith.constant 33 : index
      %233 = memref.load %arg3[%c33] : memref<98xf32, #tpu.memory_space<smem>>
      %234 = vector.extract_strided_slice %207 {offsets = [0, 5], sizes = [16, 16], strides = [1, 1]} : vector<16x128xf32> to vector<16x16xf32>
      %235 = vector.broadcast %233 : f32 to vector<16x16xf32>
      %236 = arith.mulf %235, %234 : vector<16x16xf32>
      %237 = arith.addf %232, %236 : vector<16x16xf32>
      %c34 = arith.constant 34 : index
      %238 = memref.load %arg3[%c34] : memref<98xf32, #tpu.memory_space<smem>>
      %239 = vector.extract_strided_slice %207 {offsets = [0, 6], sizes = [16, 16], strides = [1, 1]} : vector<16x128xf32> to vector<16x16xf32>
      %240 = vector.broadcast %238 : f32 to vector<16x16xf32>
      %241 = arith.mulf %240, %239 : vector<16x16xf32>
      %242 = arith.addf %237, %241 : vector<16x16xf32>
      %c0_69 = arith.constant 0 : index
      %c5_70 = arith.constant 5 : index
      %c0_71 = arith.constant 0 : index
      %243 = vector.load %arg6[%c0_69, %c5_70, %c0_71] : memref<2x24x128xf32, #tpu.memory_space<vmem>>, vector<1x16x128xf32>
      %244 = vector.shape_cast %243 : vector<1x16x128xf32> to vector<16x128xf32>
      %c35 = arith.constant 35 : index
      %245 = memref.load %arg3[%c35] : memref<98xf32, #tpu.memory_space<smem>>
      %246 = vector.extract_strided_slice %244 {offsets = [0, 0], sizes = [16, 16], strides = [1, 1]} : vector<16x128xf32> to vector<16x16xf32>
      %247 = vector.broadcast %245 : f32 to vector<16x16xf32>
      %248 = arith.mulf %247, %246 : vector<16x16xf32>
      %249 = arith.addf %242, %248 : vector<16x16xf32>
      %c36 = arith.constant 36 : index
      %250 = memref.load %arg3[%c36] : memref<98xf32, #tpu.memory_space<smem>>
      %251 = vector.extract_strided_slice %244 {offsets = [0, 1], sizes = [16, 16], strides = [1, 1]} : vector<16x128xf32> to vector<16x16xf32>
      %252 = vector.broadcast %250 : f32 to vector<16x16xf32>
      %253 = arith.mulf %252, %251 : vector<16x16xf32>
      %254 = arith.addf %249, %253 : vector<16x16xf32>
      %c37 = arith.constant 37 : index
      %255 = memref.load %arg3[%c37] : memref<98xf32, #tpu.memory_space<smem>>
      %256 = vector.extract_strided_slice %244 {offsets = [0, 2], sizes = [16, 16], strides = [1, 1]} : vector<16x128xf32> to vector<16x16xf32>
      %257 = vector.broadcast %255 : f32 to vector<16x16xf32>
      %258 = arith.mulf %257, %256 : vector<16x16xf32>
      %259 = arith.addf %254, %258 : vector<16x16xf32>
      %c38 = arith.constant 38 : index
      %260 = memref.load %arg3[%c38] : memref<98xf32, #tpu.memory_space<smem>>
      %261 = vector.extract_strided_slice %244 {offsets = [0, 3], sizes = [16, 16], strides = [1, 1]} : vector<16x128xf32> to vector<16x16xf32>
      %262 = vector.broadcast %260 : f32 to vector<16x16xf32>
      %263 = arith.mulf %262, %261 : vector<16x16xf32>
      %264 = arith.addf %259, %263 : vector<16x16xf32>
      %c39 = arith.constant 39 : index
      %265 = memref.load %arg3[%c39] : memref<98xf32, #tpu.memory_space<smem>>
      %266 = vector.extract_strided_slice %244 {offsets = [0, 4], sizes = [16, 16], strides = [1, 1]} : vector<16x128xf32> to vector<16x16xf32>
      %267 = vector.broadcast %265 : f32 to vector<16x16xf32>
      %268 = arith.mulf %267, %266 : vector<16x16xf32>
      %269 = arith.addf %264, %268 : vector<16x16xf32>
      %c40 = arith.constant 40 : index
      %270 = memref.load %arg3[%c40] : memref<98xf32, #tpu.memory_space<smem>>
      %271 = vector.extract_strided_slice %244 {offsets = [0, 5], sizes = [16, 16], strides = [1, 1]} : vector<16x128xf32> to vector<16x16xf32>
      %272 = vector.broadcast %270 : f32 to vector<16x16xf32>
      %273 = arith.mulf %272, %271 : vector<16x16xf32>
      %274 = arith.addf %269, %273 : vector<16x16xf32>
      %c41 = arith.constant 41 : index
      %275 = memref.load %arg3[%c41] : memref<98xf32, #tpu.memory_space<smem>>
      %276 = vector.extract_strided_slice %244 {offsets = [0, 6], sizes = [16, 16], strides = [1, 1]} : vector<16x128xf32> to vector<16x16xf32>
      %277 = vector.broadcast %275 : f32 to vector<16x16xf32>
      %278 = arith.mulf %277, %276 : vector<16x16xf32>
      %279 = arith.addf %274, %278 : vector<16x16xf32>
      %c0_72 = arith.constant 0 : index
      %c6_73 = arith.constant 6 : index
      %c0_74 = arith.constant 0 : index
      %280 = vector.load %arg6[%c0_72, %c6_73, %c0_74] : memref<2x24x128xf32, #tpu.memory_space<vmem>>, vector<1x16x128xf32>
      %281 = vector.shape_cast %280 : vector<1x16x128xf32> to vector<16x128xf32>
      %c42 = arith.constant 42 : index
      %282 = memref.load %arg3[%c42] : memref<98xf32, #tpu.memory_space<smem>>
      %283 = vector.extract_strided_slice %281 {offsets = [0, 0], sizes = [16, 16], strides = [1, 1]} : vector<16x128xf32> to vector<16x16xf32>
      %284 = vector.broadcast %282 : f32 to vector<16x16xf32>
      %285 = arith.mulf %284, %283 : vector<16x16xf32>
      %286 = arith.addf %279, %285 : vector<16x16xf32>
      %c43 = arith.constant 43 : index
      %287 = memref.load %arg3[%c43] : memref<98xf32, #tpu.memory_space<smem>>
      %288 = vector.extract_strided_slice %281 {offsets = [0, 1], sizes = [16, 16], strides = [1, 1]} : vector<16x128xf32> to vector<16x16xf32>
      %289 = vector.broadcast %287 : f32 to vector<16x16xf32>
      %290 = arith.mulf %289, %288 : vector<16x16xf32>
      %291 = arith.addf %286, %290 : vector<16x16xf32>
      %c44 = arith.constant 44 : index
      %292 = memref.load %arg3[%c44] : memref<98xf32, #tpu.memory_space<smem>>
      %293 = vector.extract_strided_slice %281 {offsets = [0, 2], sizes = [16, 16], strides = [1, 1]} : vector<16x128xf32> to vector<16x16xf32>
      %294 = vector.broadcast %292 : f32 to vector<16x16xf32>
      %295 = arith.mulf %294, %293 : vector<16x16xf32>
      %296 = arith.addf %291, %295 : vector<16x16xf32>
      %c45 = arith.constant 45 : index
      %297 = memref.load %arg3[%c45] : memref<98xf32, #tpu.memory_space<smem>>
      %298 = vector.extract_strided_slice %281 {offsets = [0, 3], sizes = [16, 16], strides = [1, 1]} : vector<16x128xf32> to vector<16x16xf32>
      %299 = vector.broadcast %297 : f32 to vector<16x16xf32>
      %300 = arith.mulf %299, %298 : vector<16x16xf32>
      %301 = arith.addf %296, %300 : vector<16x16xf32>
      %c46 = arith.constant 46 : index
      %302 = memref.load %arg3[%c46] : memref<98xf32, #tpu.memory_space<smem>>
      %303 = vector.extract_strided_slice %281 {offsets = [0, 4], sizes = [16, 16], strides = [1, 1]} : vector<16x128xf32> to vector<16x16xf32>
      %304 = vector.broadcast %302 : f32 to vector<16x16xf32>
      %305 = arith.mulf %304, %303 : vector<16x16xf32>
      %306 = arith.addf %301, %305 : vector<16x16xf32>
      %c47 = arith.constant 47 : index
      %307 = memref.load %arg3[%c47] : memref<98xf32, #tpu.memory_space<smem>>
      %308 = vector.extract_strided_slice %281 {offsets = [0, 5], sizes = [16, 16], strides = [1, 1]} : vector<16x128xf32> to vector<16x16xf32>
      %309 = vector.broadcast %307 : f32 to vector<16x16xf32>
      %310 = arith.mulf %309, %308 : vector<16x16xf32>
      %311 = arith.addf %306, %310 : vector<16x16xf32>
      %c48 = arith.constant 48 : index
      %312 = memref.load %arg3[%c48] : memref<98xf32, #tpu.memory_space<smem>>
      %313 = vector.extract_strided_slice %281 {offsets = [0, 6], sizes = [16, 16], strides = [1, 1]} : vector<16x128xf32> to vector<16x16xf32>
      %314 = vector.broadcast %312 : f32 to vector<16x16xf32>
      %315 = arith.mulf %314, %313 : vector<16x16xf32>
      %316 = arith.addf %311, %315 : vector<16x16xf32>
      %c1_75 = arith.constant 1 : index
      %c0_76 = arith.constant 0 : index
      %c0_77 = arith.constant 0 : index
      %317 = vector.load %arg6[%c1_75, %c0_76, %c0_77] : memref<2x24x128xf32, #tpu.memory_space<vmem>>, vector<1x16x128xf32>
      %318 = vector.shape_cast %317 : vector<1x16x128xf32> to vector<16x128xf32>
      %c49 = arith.constant 49 : index
      %319 = memref.load %arg3[%c49] : memref<98xf32, #tpu.memory_space<smem>>
      %320 = vector.extract_strided_slice %318 {offsets = [0, 0], sizes = [16, 16], strides = [1, 1]} : vector<16x128xf32> to vector<16x16xf32>
      %321 = vector.broadcast %319 : f32 to vector<16x16xf32>
      %322 = arith.mulf %321, %320 : vector<16x16xf32>
      %323 = arith.addf %316, %322 : vector<16x16xf32>
      %c50 = arith.constant 50 : index
      %324 = memref.load %arg3[%c50] : memref<98xf32, #tpu.memory_space<smem>>
      %325 = vector.extract_strided_slice %318 {offsets = [0, 1], sizes = [16, 16], strides = [1, 1]} : vector<16x128xf32> to vector<16x16xf32>
      %326 = vector.broadcast %324 : f32 to vector<16x16xf32>
      %327 = arith.mulf %326, %325 : vector<16x16xf32>
      %328 = arith.addf %323, %327 : vector<16x16xf32>
      %c51 = arith.constant 51 : index
      %329 = memref.load %arg3[%c51] : memref<98xf32, #tpu.memory_space<smem>>
      %330 = vector.extract_strided_slice %318 {offsets = [0, 2], sizes = [16, 16], strides = [1, 1]} : vector<16x128xf32> to vector<16x16xf32>
      %331 = vector.broadcast %329 : f32 to vector<16x16xf32>
      %332 = arith.mulf %331, %330 : vector<16x16xf32>
      %333 = arith.addf %328, %332 : vector<16x16xf32>
      %c52 = arith.constant 52 : index
      %334 = memref.load %arg3[%c52] : memref<98xf32, #tpu.memory_space<smem>>
      %335 = vector.extract_strided_slice %318 {offsets = [0, 3], sizes = [16, 16], strides = [1, 1]} : vector<16x128xf32> to vector<16x16xf32>
      %336 = vector.broadcast %334 : f32 to vector<16x16xf32>
      %337 = arith.mulf %336, %335 : vector<16x16xf32>
      %338 = arith.addf %333, %337 : vector<16x16xf32>
      %c53 = arith.constant 53 : index
      %339 = memref.load %arg3[%c53] : memref<98xf32, #tpu.memory_space<smem>>
      %340 = vector.extract_strided_slice %318 {offsets = [0, 4], sizes = [16, 16], strides = [1, 1]} : vector<16x128xf32> to vector<16x16xf32>
      %341 = vector.broadcast %339 : f32 to vector<16x16xf32>
      %342 = arith.mulf %341, %340 : vector<16x16xf32>
      %343 = arith.addf %338, %342 : vector<16x16xf32>
      %c54 = arith.constant 54 : index
      %344 = memref.load %arg3[%c54] : memref<98xf32, #tpu.memory_space<smem>>
      %345 = vector.extract_strided_slice %318 {offsets = [0, 5], sizes = [16, 16], strides = [1, 1]} : vector<16x128xf32> to vector<16x16xf32>
      %346 = vector.broadcast %344 : f32 to vector<16x16xf32>
      %347 = arith.mulf %346, %345 : vector<16x16xf32>
      %348 = arith.addf %343, %347 : vector<16x16xf32>
      %c55 = arith.constant 55 : index
      %349 = memref.load %arg3[%c55] : memref<98xf32, #tpu.memory_space<smem>>
      %350 = vector.extract_strided_slice %318 {offsets = [0, 6], sizes = [16, 16], strides = [1, 1]} : vector<16x128xf32> to vector<16x16xf32>
      %351 = vector.broadcast %349 : f32 to vector<16x16xf32>
      %352 = arith.mulf %351, %350 : vector<16x16xf32>
      %353 = arith.addf %348, %352 : vector<16x16xf32>
      %c1_78 = arith.constant 1 : index
      %c1_79 = arith.constant 1 : index
      %c0_80 = arith.constant 0 : index
      %354 = vector.load %arg6[%c1_78, %c1_79, %c0_80] : memref<2x24x128xf32, #tpu.memory_space<vmem>>, vector<1x16x128xf32>
      %355 = vector.shape_cast %354 : vector<1x16x128xf32> to vector<16x128xf32>
      %c56 = arith.constant 56 : index
      %356 = memref.load %arg3[%c56] : memref<98xf32, #tpu.memory_space<smem>>
      %357 = vector.extract_strided_slice %355 {offsets = [0, 0], sizes = [16, 16], strides = [1, 1]} : vector<16x128xf32> to vector<16x16xf32>
      %358 = vector.broadcast %356 : f32 to vector<16x16xf32>
      %359 = arith.mulf %358, %357 : vector<16x16xf32>
      %360 = arith.addf %353, %359 : vector<16x16xf32>
      %c57 = arith.constant 57 : index
      %361 = memref.load %arg3[%c57] : memref<98xf32, #tpu.memory_space<smem>>
      %362 = vector.extract_strided_slice %355 {offsets = [0, 1], sizes = [16, 16], strides = [1, 1]} : vector<16x128xf32> to vector<16x16xf32>
      %363 = vector.broadcast %361 : f32 to vector<16x16xf32>
      %364 = arith.mulf %363, %362 : vector<16x16xf32>
      %365 = arith.addf %360, %364 : vector<16x16xf32>
      %c58 = arith.constant 58 : index
      %366 = memref.load %arg3[%c58] : memref<98xf32, #tpu.memory_space<smem>>
      %367 = vector.extract_strided_slice %355 {offsets = [0, 2], sizes = [16, 16], strides = [1, 1]} : vector<16x128xf32> to vector<16x16xf32>
      %368 = vector.broadcast %366 : f32 to vector<16x16xf32>
      %369 = arith.mulf %368, %367 : vector<16x16xf32>
      %370 = arith.addf %365, %369 : vector<16x16xf32>
      %c59 = arith.constant 59 : index
      %371 = memref.load %arg3[%c59] : memref<98xf32, #tpu.memory_space<smem>>
      %372 = vector.extract_strided_slice %355 {offsets = [0, 3], sizes = [16, 16], strides = [1, 1]} : vector<16x128xf32> to vector<16x16xf32>
      %373 = vector.broadcast %371 : f32 to vector<16x16xf32>
      %374 = arith.mulf %373, %372 : vector<16x16xf32>
      %375 = arith.addf %370, %374 : vector<16x16xf32>
      %c60 = arith.constant 60 : index
      %376 = memref.load %arg3[%c60] : memref<98xf32, #tpu.memory_space<smem>>
      %377 = vector.extract_strided_slice %355 {offsets = [0, 4], sizes = [16, 16], strides = [1, 1]} : vector<16x128xf32> to vector<16x16xf32>
      %378 = vector.broadcast %376 : f32 to vector<16x16xf32>
      %379 = arith.mulf %378, %377 : vector<16x16xf32>
      %380 = arith.addf %375, %379 : vector<16x16xf32>
      %c61 = arith.constant 61 : index
      %381 = memref.load %arg3[%c61] : memref<98xf32, #tpu.memory_space<smem>>
      %382 = vector.extract_strided_slice %355 {offsets = [0, 5], sizes = [16, 16], strides = [1, 1]} : vector<16x128xf32> to vector<16x16xf32>
      %383 = vector.broadcast %381 : f32 to vector<16x16xf32>
      %384 = arith.mulf %383, %382 : vector<16x16xf32>
      %385 = arith.addf %380, %384 : vector<16x16xf32>
      %c62 = arith.constant 62 : index
      %386 = memref.load %arg3[%c62] : memref<98xf32, #tpu.memory_space<smem>>
      %387 = vector.extract_strided_slice %355 {offsets = [0, 6], sizes = [16, 16], strides = [1, 1]} : vector<16x128xf32> to vector<16x16xf32>
      %388 = vector.broadcast %386 : f32 to vector<16x16xf32>
      %389 = arith.mulf %388, %387 : vector<16x16xf32>
      %390 = arith.addf %385, %389 : vector<16x16xf32>
      %c1_81 = arith.constant 1 : index
      %c2_82 = arith.constant 2 : index
      %c0_83 = arith.constant 0 : index
      %391 = vector.load %arg6[%c1_81, %c2_82, %c0_83] : memref<2x24x128xf32, #tpu.memory_space<vmem>>, vector<1x16x128xf32>
      %392 = vector.shape_cast %391 : vector<1x16x128xf32> to vector<16x128xf32>
      %c63 = arith.constant 63 : index
      %393 = memref.load %arg3[%c63] : memref<98xf32, #tpu.memory_space<smem>>
      %394 = vector.extract_strided_slice %392 {offsets = [0, 0], sizes = [16, 16], strides = [1, 1]} : vector<16x128xf32> to vector<16x16xf32>
      %395 = vector.broadcast %393 : f32 to vector<16x16xf32>
      %396 = arith.mulf %395, %394 : vector<16x16xf32>
      %397 = arith.addf %390, %396 : vector<16x16xf32>
      %c64 = arith.constant 64 : index
      %398 = memref.load %arg3[%c64] : memref<98xf32, #tpu.memory_space<smem>>
      %399 = vector.extract_strided_slice %392 {offsets = [0, 1], sizes = [16, 16], strides = [1, 1]} : vector<16x128xf32> to vector<16x16xf32>
      %400 = vector.broadcast %398 : f32 to vector<16x16xf32>
      %401 = arith.mulf %400, %399 : vector<16x16xf32>
      %402 = arith.addf %397, %401 : vector<16x16xf32>
      %c65 = arith.constant 65 : index
      %403 = memref.load %arg3[%c65] : memref<98xf32, #tpu.memory_space<smem>>
      %404 = vector.extract_strided_slice %392 {offsets = [0, 2], sizes = [16, 16], strides = [1, 1]} : vector<16x128xf32> to vector<16x16xf32>
      %405 = vector.broadcast %403 : f32 to vector<16x16xf32>
      %406 = arith.mulf %405, %404 : vector<16x16xf32>
      %407 = arith.addf %402, %406 : vector<16x16xf32>
      %c66 = arith.constant 66 : index
      %408 = memref.load %arg3[%c66] : memref<98xf32, #tpu.memory_space<smem>>
      %409 = vector.extract_strided_slice %392 {offsets = [0, 3], sizes = [16, 16], strides = [1, 1]} : vector<16x128xf32> to vector<16x16xf32>
      %410 = vector.broadcast %408 : f32 to vector<16x16xf32>
      %411 = arith.mulf %410, %409 : vector<16x16xf32>
      %412 = arith.addf %407, %411 : vector<16x16xf32>
      %c67 = arith.constant 67 : index
      %413 = memref.load %arg3[%c67] : memref<98xf32, #tpu.memory_space<smem>>
      %414 = vector.extract_strided_slice %392 {offsets = [0, 4], sizes = [16, 16], strides = [1, 1]} : vector<16x128xf32> to vector<16x16xf32>
      %415 = vector.broadcast %413 : f32 to vector<16x16xf32>
      %416 = arith.mulf %415, %414 : vector<16x16xf32>
      %417 = arith.addf %412, %416 : vector<16x16xf32>
      %c68 = arith.constant 68 : index
      %418 = memref.load %arg3[%c68] : memref<98xf32, #tpu.memory_space<smem>>
      %419 = vector.extract_strided_slice %392 {offsets = [0, 5], sizes = [16, 16], strides = [1, 1]} : vector<16x128xf32> to vector<16x16xf32>
      %420 = vector.broadcast %418 : f32 to vector<16x16xf32>
      %421 = arith.mulf %420, %419 : vector<16x16xf32>
      %422 = arith.addf %417, %421 : vector<16x16xf32>
      %c69 = arith.constant 69 : index
      %423 = memref.load %arg3[%c69] : memref<98xf32, #tpu.memory_space<smem>>
      %424 = vector.extract_strided_slice %392 {offsets = [0, 6], sizes = [16, 16], strides = [1, 1]} : vector<16x128xf32> to vector<16x16xf32>
      %425 = vector.broadcast %423 : f32 to vector<16x16xf32>
      %426 = arith.mulf %425, %424 : vector<16x16xf32>
      %427 = arith.addf %422, %426 : vector<16x16xf32>
      %c1_84 = arith.constant 1 : index
      %c3_85 = arith.constant 3 : index
      %c0_86 = arith.constant 0 : index
      %428 = vector.load %arg6[%c1_84, %c3_85, %c0_86] : memref<2x24x128xf32, #tpu.memory_space<vmem>>, vector<1x16x128xf32>
      %429 = vector.shape_cast %428 : vector<1x16x128xf32> to vector<16x128xf32>
      %c70 = arith.constant 70 : index
      %430 = memref.load %arg3[%c70] : memref<98xf32, #tpu.memory_space<smem>>
      %431 = vector.extract_strided_slice %429 {offsets = [0, 0], sizes = [16, 16], strides = [1, 1]} : vector<16x128xf32> to vector<16x16xf32>
      %432 = vector.broadcast %430 : f32 to vector<16x16xf32>
      %433 = arith.mulf %432, %431 : vector<16x16xf32>
      %434 = arith.addf %427, %433 : vector<16x16xf32>
      %c71 = arith.constant 71 : index
      %435 = memref.load %arg3[%c71] : memref<98xf32, #tpu.memory_space<smem>>
      %436 = vector.extract_strided_slice %429 {offsets = [0, 1], sizes = [16, 16], strides = [1, 1]} : vector<16x128xf32> to vector<16x16xf32>
      %437 = vector.broadcast %435 : f32 to vector<16x16xf32>
      %438 = arith.mulf %437, %436 : vector<16x16xf32>
      %439 = arith.addf %434, %438 : vector<16x16xf32>
      %c72 = arith.constant 72 : index
      %440 = memref.load %arg3[%c72] : memref<98xf32, #tpu.memory_space<smem>>
      %441 = vector.extract_strided_slice %429 {offsets = [0, 2], sizes = [16, 16], strides = [1, 1]} : vector<16x128xf32> to vector<16x16xf32>
      %442 = vector.broadcast %440 : f32 to vector<16x16xf32>
      %443 = arith.mulf %442, %441 : vector<16x16xf32>
      %444 = arith.addf %439, %443 : vector<16x16xf32>
      %c73 = arith.constant 73 : index
      %445 = memref.load %arg3[%c73] : memref<98xf32, #tpu.memory_space<smem>>
      %446 = vector.extract_strided_slice %429 {offsets = [0, 3], sizes = [16, 16], strides = [1, 1]} : vector<16x128xf32> to vector<16x16xf32>
      %447 = vector.broadcast %445 : f32 to vector<16x16xf32>
      %448 = arith.mulf %447, %446 : vector<16x16xf32>
      %449 = arith.addf %444, %448 : vector<16x16xf32>
      %c74 = arith.constant 74 : index
      %450 = memref.load %arg3[%c74] : memref<98xf32, #tpu.memory_space<smem>>
      %451 = vector.extract_strided_slice %429 {offsets = [0, 4], sizes = [16, 16], strides = [1, 1]} : vector<16x128xf32> to vector<16x16xf32>
      %452 = vector.broadcast %450 : f32 to vector<16x16xf32>
      %453 = arith.mulf %452, %451 : vector<16x16xf32>
      %454 = arith.addf %449, %453 : vector<16x16xf32>
      %c75 = arith.constant 75 : index
      %455 = memref.load %arg3[%c75] : memref<98xf32, #tpu.memory_space<smem>>
      %456 = vector.extract_strided_slice %429 {offsets = [0, 5], sizes = [16, 16], strides = [1, 1]} : vector<16x128xf32> to vector<16x16xf32>
      %457 = vector.broadcast %455 : f32 to vector<16x16xf32>
      %458 = arith.mulf %457, %456 : vector<16x16xf32>
      %459 = arith.addf %454, %458 : vector<16x16xf32>
      %c76 = arith.constant 76 : index
      %460 = memref.load %arg3[%c76] : memref<98xf32, #tpu.memory_space<smem>>
      %461 = vector.extract_strided_slice %429 {offsets = [0, 6], sizes = [16, 16], strides = [1, 1]} : vector<16x128xf32> to vector<16x16xf32>
      %462 = vector.broadcast %460 : f32 to vector<16x16xf32>
      %463 = arith.mulf %462, %461 : vector<16x16xf32>
      %464 = arith.addf %459, %463 : vector<16x16xf32>
      %c1_87 = arith.constant 1 : index
      %c4_88 = arith.constant 4 : index
      %c0_89 = arith.constant 0 : index
      %465 = vector.load %arg6[%c1_87, %c4_88, %c0_89] : memref<2x24x128xf32, #tpu.memory_space<vmem>>, vector<1x16x128xf32>
      %466 = vector.shape_cast %465 : vector<1x16x128xf32> to vector<16x128xf32>
      %c77 = arith.constant 77 : index
      %467 = memref.load %arg3[%c77] : memref<98xf32, #tpu.memory_space<smem>>
      %468 = vector.extract_strided_slice %466 {offsets = [0, 0], sizes = [16, 16], strides = [1, 1]} : vector<16x128xf32> to vector<16x16xf32>
      %469 = vector.broadcast %467 : f32 to vector<16x16xf32>
      %470 = arith.mulf %469, %468 : vector<16x16xf32>
      %471 = arith.addf %464, %470 : vector<16x16xf32>
      %c78 = arith.constant 78 : index
      %472 = memref.load %arg3[%c78] : memref<98xf32, #tpu.memory_space<smem>>
      %473 = vector.extract_strided_slice %466 {offsets = [0, 1], sizes = [16, 16], strides = [1, 1]} : vector<16x128xf32> to vector<16x16xf32>
      %474 = vector.broadcast %472 : f32 to vector<16x16xf32>
      %475 = arith.mulf %474, %473 : vector<16x16xf32>
      %476 = arith.addf %471, %475 : vector<16x16xf32>
      %c79 = arith.constant 79 : index
      %477 = memref.load %arg3[%c79] : memref<98xf32, #tpu.memory_space<smem>>
      %478 = vector.extract_strided_slice %466 {offsets = [0, 2], sizes = [16, 16], strides = [1, 1]} : vector<16x128xf32> to vector<16x16xf32>
      %479 = vector.broadcast %477 : f32 to vector<16x16xf32>
      %480 = arith.mulf %479, %478 : vector<16x16xf32>
      %481 = arith.addf %476, %480 : vector<16x16xf32>
      %c80 = arith.constant 80 : index
      %482 = memref.load %arg3[%c80] : memref<98xf32, #tpu.memory_space<smem>>
      %483 = vector.extract_strided_slice %466 {offsets = [0, 3], sizes = [16, 16], strides = [1, 1]} : vector<16x128xf32> to vector<16x16xf32>
      %484 = vector.broadcast %482 : f32 to vector<16x16xf32>
      %485 = arith.mulf %484, %483 : vector<16x16xf32>
      %486 = arith.addf %481, %485 : vector<16x16xf32>
      %c81 = arith.constant 81 : index
      %487 = memref.load %arg3[%c81] : memref<98xf32, #tpu.memory_space<smem>>
      %488 = vector.extract_strided_slice %466 {offsets = [0, 4], sizes = [16, 16], strides = [1, 1]} : vector<16x128xf32> to vector<16x16xf32>
      %489 = vector.broadcast %487 : f32 to vector<16x16xf32>
      %490 = arith.mulf %489, %488 : vector<16x16xf32>
      %491 = arith.addf %486, %490 : vector<16x16xf32>
      %c82 = arith.constant 82 : index
      %492 = memref.load %arg3[%c82] : memref<98xf32, #tpu.memory_space<smem>>
      %493 = vector.extract_strided_slice %466 {offsets = [0, 5], sizes = [16, 16], strides = [1, 1]} : vector<16x128xf32> to vector<16x16xf32>
      %494 = vector.broadcast %492 : f32 to vector<16x16xf32>
      %495 = arith.mulf %494, %493 : vector<16x16xf32>
      %496 = arith.addf %491, %495 : vector<16x16xf32>
      %c83 = arith.constant 83 : index
      %497 = memref.load %arg3[%c83] : memref<98xf32, #tpu.memory_space<smem>>
      %498 = vector.extract_strided_slice %466 {offsets = [0, 6], sizes = [16, 16], strides = [1, 1]} : vector<16x128xf32> to vector<16x16xf32>
      %499 = vector.broadcast %497 : f32 to vector<16x16xf32>
      %500 = arith.mulf %499, %498 : vector<16x16xf32>
      %501 = arith.addf %496, %500 : vector<16x16xf32>
      %c1_90 = arith.constant 1 : index
      %c5_91 = arith.constant 5 : index
      %c0_92 = arith.constant 0 : index
      %502 = vector.load %arg6[%c1_90, %c5_91, %c0_92] : memref<2x24x128xf32, #tpu.memory_space<vmem>>, vector<1x16x128xf32>
      %503 = vector.shape_cast %502 : vector<1x16x128xf32> to vector<16x128xf32>
      %c84 = arith.constant 84 : index
      %504 = memref.load %arg3[%c84] : memref<98xf32, #tpu.memory_space<smem>>
      %505 = vector.extract_strided_slice %503 {offsets = [0, 0], sizes = [16, 16], strides = [1, 1]} : vector<16x128xf32> to vector<16x16xf32>
      %506 = vector.broadcast %504 : f32 to vector<16x16xf32>
      %507 = arith.mulf %506, %505 : vector<16x16xf32>
      %508 = arith.addf %501, %507 : vector<16x16xf32>
      %c85 = arith.constant 85 : index
      %509 = memref.load %arg3[%c85] : memref<98xf32, #tpu.memory_space<smem>>
      %510 = vector.extract_strided_slice %503 {offsets = [0, 1], sizes = [16, 16], strides = [1, 1]} : vector<16x128xf32> to vector<16x16xf32>
      %511 = vector.broadcast %509 : f32 to vector<16x16xf32>
      %512 = arith.mulf %511, %510 : vector<16x16xf32>
      %513 = arith.addf %508, %512 : vector<16x16xf32>
      %c86 = arith.constant 86 : index
      %514 = memref.load %arg3[%c86] : memref<98xf32, #tpu.memory_space<smem>>
      %515 = vector.extract_strided_slice %503 {offsets = [0, 2], sizes = [16, 16], strides = [1, 1]} : vector<16x128xf32> to vector<16x16xf32>
      %516 = vector.broadcast %514 : f32 to vector<16x16xf32>
      %517 = arith.mulf %516, %515 : vector<16x16xf32>
      %518 = arith.addf %513, %517 : vector<16x16xf32>
      %c87 = arith.constant 87 : index
      %519 = memref.load %arg3[%c87] : memref<98xf32, #tpu.memory_space<smem>>
      %520 = vector.extract_strided_slice %503 {offsets = [0, 3], sizes = [16, 16], strides = [1, 1]} : vector<16x128xf32> to vector<16x16xf32>
      %521 = vector.broadcast %519 : f32 to vector<16x16xf32>
      %522 = arith.mulf %521, %520 : vector<16x16xf32>
      %523 = arith.addf %518, %522 : vector<16x16xf32>
      %c88 = arith.constant 88 : index
      %524 = memref.load %arg3[%c88] : memref<98xf32, #tpu.memory_space<smem>>
      %525 = vector.extract_strided_slice %503 {offsets = [0, 4], sizes = [16, 16], strides = [1, 1]} : vector<16x128xf32> to vector<16x16xf32>
      %526 = vector.broadcast %524 : f32 to vector<16x16xf32>
      %527 = arith.mulf %526, %525 : vector<16x16xf32>
      %528 = arith.addf %523, %527 : vector<16x16xf32>
      %c89 = arith.constant 89 : index
      %529 = memref.load %arg3[%c89] : memref<98xf32, #tpu.memory_space<smem>>
      %530 = vector.extract_strided_slice %503 {offsets = [0, 5], sizes = [16, 16], strides = [1, 1]} : vector<16x128xf32> to vector<16x16xf32>
      %531 = vector.broadcast %529 : f32 to vector<16x16xf32>
      %532 = arith.mulf %531, %530 : vector<16x16xf32>
      %533 = arith.addf %528, %532 : vector<16x16xf32>
      %c90 = arith.constant 90 : index
      %534 = memref.load %arg3[%c90] : memref<98xf32, #tpu.memory_space<smem>>
      %535 = vector.extract_strided_slice %503 {offsets = [0, 6], sizes = [16, 16], strides = [1, 1]} : vector<16x128xf32> to vector<16x16xf32>
      %536 = vector.broadcast %534 : f32 to vector<16x16xf32>
      %537 = arith.mulf %536, %535 : vector<16x16xf32>
      %538 = arith.addf %533, %537 : vector<16x16xf32>
      %c1_93 = arith.constant 1 : index
      %c6_94 = arith.constant 6 : index
      %c0_95 = arith.constant 0 : index
      %539 = vector.load %arg6[%c1_93, %c6_94, %c0_95] : memref<2x24x128xf32, #tpu.memory_space<vmem>>, vector<1x16x128xf32>
      %540 = vector.shape_cast %539 : vector<1x16x128xf32> to vector<16x128xf32>
      %c91 = arith.constant 91 : index
      %541 = memref.load %arg3[%c91] : memref<98xf32, #tpu.memory_space<smem>>
      %542 = vector.extract_strided_slice %540 {offsets = [0, 0], sizes = [16, 16], strides = [1, 1]} : vector<16x128xf32> to vector<16x16xf32>
      %543 = vector.broadcast %541 : f32 to vector<16x16xf32>
      %544 = arith.mulf %543, %542 : vector<16x16xf32>
      %545 = arith.addf %538, %544 : vector<16x16xf32>
      %c92 = arith.constant 92 : index
      %546 = memref.load %arg3[%c92] : memref<98xf32, #tpu.memory_space<smem>>
      %547 = vector.extract_strided_slice %540 {offsets = [0, 1], sizes = [16, 16], strides = [1, 1]} : vector<16x128xf32> to vector<16x16xf32>
      %548 = vector.broadcast %546 : f32 to vector<16x16xf32>
      %549 = arith.mulf %548, %547 : vector<16x16xf32>
      %550 = arith.addf %545, %549 : vector<16x16xf32>
      %c93 = arith.constant 93 : index
      %551 = memref.load %arg3[%c93] : memref<98xf32, #tpu.memory_space<smem>>
      %552 = vector.extract_strided_slice %540 {offsets = [0, 2], sizes = [16, 16], strides = [1, 1]} : vector<16x128xf32> to vector<16x16xf32>
      %553 = vector.broadcast %551 : f32 to vector<16x16xf32>
      %554 = arith.mulf %553, %552 : vector<16x16xf32>
      %555 = arith.addf %550, %554 : vector<16x16xf32>
      %c94 = arith.constant 94 : index
      %556 = memref.load %arg3[%c94] : memref<98xf32, #tpu.memory_space<smem>>
      %557 = vector.extract_strided_slice %540 {offsets = [0, 3], sizes = [16, 16], strides = [1, 1]} : vector<16x128xf32> to vector<16x16xf32>
      %558 = vector.broadcast %556 : f32 to vector<16x16xf32>
      %559 = arith.mulf %558, %557 : vector<16x16xf32>
      %560 = arith.addf %555, %559 : vector<16x16xf32>
      %c95 = arith.constant 95 : index
      %561 = memref.load %arg3[%c95] : memref<98xf32, #tpu.memory_space<smem>>
      %562 = vector.extract_strided_slice %540 {offsets = [0, 4], sizes = [16, 16], strides = [1, 1]} : vector<16x128xf32> to vector<16x16xf32>
      %563 = vector.broadcast %561 : f32 to vector<16x16xf32>
      %564 = arith.mulf %563, %562 : vector<16x16xf32>
      %565 = arith.addf %560, %564 : vector<16x16xf32>
      %c96 = arith.constant 96 : index
      %566 = memref.load %arg3[%c96] : memref<98xf32, #tpu.memory_space<smem>>
      %567 = vector.extract_strided_slice %540 {offsets = [0, 5], sizes = [16, 16], strides = [1, 1]} : vector<16x128xf32> to vector<16x16xf32>
      %568 = vector.broadcast %566 : f32 to vector<16x16xf32>
      %569 = arith.mulf %568, %567 : vector<16x16xf32>
      %570 = arith.addf %565, %569 : vector<16x16xf32>
      %c97 = arith.constant 97 : index
      %571 = memref.load %arg3[%c97] : memref<98xf32, #tpu.memory_space<smem>>
      %572 = vector.extract_strided_slice %540 {offsets = [0, 6], sizes = [16, 16], strides = [1, 1]} : vector<16x128xf32> to vector<16x16xf32>
      %573 = vector.broadcast %571 : f32 to vector<16x16xf32>
      %574 = arith.mulf %573, %572 : vector<16x16xf32>
      %575 = arith.addf %570, %574 : vector<16x16xf32>
      %576 = arith.negf %575 : vector<16x16xf32>
      %577 = math.exp %576 : vector<16x16xf32>
      %cst_96 = arith.constant 1.000000e+00 : f32
      %578 = vector.broadcast %cst_96 : f32 to vector<16x16xf32>
      %579 = arith.addf %578, %577 : vector<16x16xf32>
      %580 = arith.divf %578, %579 : vector<16x16xf32>
      %c0_97 = arith.constant 0 : index
      %c0_98 = arith.constant 0 : index
      %c0_99 = arith.constant 0 : index
      %c0_100 = arith.constant 0 : index
      %581 = vector.load %arg5[%c0_97, %c0_98, %c0_99, %c0_100] : memref<1x1x16x16xf32, #tpu.memory_space<vmem>>, vector<1x1x16x16xf32>
      %582 = vector.shape_cast %581 : vector<1x1x16x16xf32> to vector<16x16xf32>
      %583 = vector.shape_cast %580 : vector<16x16xf32> to vector<1x1x16x16xf32>
      tpu.vector_store %arg5[%c0_97, %c0_98, %c0_99, %c0_100], %583 {strides = array<i32>} : memref<1x1x16x16xf32, #tpu.memory_space<vmem>>, vector<1x1x16x16xf32>,
    } else {
    }
    return
  }
  func.func @transform_0(%arg0: i32, %arg1: i32) -> (i32, i32, i32, i32) {
    %c0_i32 = arith.constant 0 : i32
    %c0_i32_0 = arith.constant 0 : i32
    %c0_i32_1 = arith.constant 0 : i32
    return %arg0, %arg1, %c0_i32, %c0_i32_0 : i32, i32, i32, i32
  }
  func.func @transform_1(%arg0: i32, %arg1: i32) -> i32 {
    %c0_i32 = arith.constant 0 : i32
    %c0_i32_0 = arith.constant 0 : i32
    return %c0_i32 : i32
  }
  func.func @transform_2(%arg0: i32, %arg1: i32) -> i32 {
    %c0_i32 = arith.constant 0 : i32
    %c0_i32_0 = arith.constant 0 : i32
    return %c0_i32 : i32
  }
  func.func @transform_3(%arg0: i32, %arg1: i32) -> (i32, i32, i32, i32) {
    %c0_i32 = arith.constant 0 : i32
    %c0_i32_0 = arith.constant 0 : i32
    %c0_i32_1 = arith.constant 0 : i32
    %c0_i32_2 = arith.constant 0 : i32
    return %arg0, %c0_i32, %c0_i32_0, %c0_i32_1 : i32, i32, i32, i32
  }
}

</mosaic_0001>

<bundles_post_ra>
// kernel: tpu_custom_call.1
= control target key start
LH: loop header
LB: loop body
LE: loop exit
PB: predicated region body
PF: predicated region fallthrough
CT: control target
= control target key end

     0   :  { %s2965_s0 = inlined_call_operand.hbm [shape: f32[2,4,16,16], index: 0, kind: input, shape index: {}]   ;;  %s2966_s1 = inlined_call_operand.vmem [shape: f32[98], index: 1, kind: input, shape index: {}]   ;;  %s2967_s2 = inlined_call_operand.<no memory space> [shape: f32[1], index: 2, kind: input, shape index: {}]   ;;  %s2968_s3 = inlined_call_operand.hbm [shape: f32[2,1,16,16], index: 3, kind: output, shape index: {}]  }
   0x1   :  { %8 = sst [smem:[#allocation5]] %s2967_s2 }
   0x2   :  { %9 = vsyncpa [#allocation7], 0 }
   0x3   :  { %11 = vsyncpa [#allocation7 + $0x1], 0 }
   0x4   :  { %12 = vsyncpa [#allocation9], 0 }
   0x5   :  { %13 = vsyncpa [#allocation8], 0 }
   0x6   :  { %15 = vsyncpa [#allocation8 + $0x1], 0  ;;  %s2141_s14 = smov 0   ;;  %s2143_s15 = smov 0  }
   0x7   :  { %s2145_s16 = smov 0   ;;  %s2147_s17 = smov 0  }
   0x8   :  { %s2149_s18 = smov 0   ;;  %s2151_s19 = smov 0  }
   0x9 LB: > { %s1751_s2 = sadd.s32 4294967295, %s2102_s19   ;;  %s1752_s20 = sadd.s32 4294967294, %s2102_s19   ;;  %s2102_s19 = sphi %s2151_s19, %s21_s19   ;;  %s2098_s18 = sphi %s2149_s18, %s2980_s18   ;;  %s2094_s17 = sphi %s2147_s17, %s2979_s17   ;;  %s2090_s16 = sphi %s2145_s16, %s2978_s16   ;;  %s2086_s15 = sphi %s2143_s15, %s2977_s15   ;;  %s2082_s14 = sphi %s2141_s14, %s2976_s14  }
   0xa   : > { %s42_s21 = sadd.s32 1, %s2090_s16  ;;  %p49_p0 = scmp.ne.s32.totalorder %s2090_s16, %s2086_s15 }
   0xb   : > { %p50_p1 = scmp.eq.s32.totalorder %s2102_s19, 0  ;;  %p55_p2 = scmp.ne.s32.totalorder %s2086_s15, %s2082_s14 }
   0xc   : > { %p2179_p3 = scmp.eq.s32.totalorder %s1751_s2, 0  ;;  %p121_p4 = scmp.eq.s32.totalorder %s1751_s2, 1 }
   0xd   : > { %p2183_p5 = por %p50_p1, %p49_p0  ;;  %p127_p6 = scmp.eq.s32.totalorder %s1752_s20, 1 }
   0xe   : > { %p2189_p7 = por %p2179_p3, %p55_p2  ;;  %p2193_p8 = por %p121_p4, %p49_p0 }
   0xf   : > { %p2197_p9 = por %p127_p6, %p55_p2  ;;  %p1753_p10 = scmp.ge.s32.totalorder %s2102_s19, 1 }
  0x10   : > { %p134_p11 = scmp.lt.s32.totalorder %s2102_s19, 3  ;;  %s146_s29 = sshll.u32 %s2966_s1, 4  ;;  %s147_s29 = int_to_ptr.vmem [resolvable:$true] %s146_s29 }
  0x11   : > { %p1755_p13 = scmp.ge.s32.totalorder %s2102_s19, 2  ;;  %p1896_p0 = scmp.lt.s32.totalorder %s2102_s19, 2 }
  0x12   : > { %p2206_p12 = pnand %p1753_p10, %p134_p11  ;;  %s33_s5 = sadd.s32 1, %s2098_s18 }
  0x13   : > { %p2216_p2 = pnand %p1896_p0, %p2183_p5  ;;  %p35_p6 = scmp.ge.s32.totalorder %s33_s5, 2 }
  0x14   : > { %p1883_p1 = pneg %p2206_p12  ;;  %s160_s6 = sand.u32 1, %s2090_s16  }
  0x15   : > { %s2104_s7 = smov [#allocation10]   ;;  %s2982_s5 = smov (%p35_p6, %s33_s5), 0 }
  0x16   : > { %p1884_p4 = pnand %p1883_p1, %p2179_p3  ;;  %s1756_s8 = sshll.u32 %s160_s6, 6 }
  0x17   : > { %s37_s9 = ssub.s32 %s2098_s18, %s2982_s5  ;;  %s1873_s10 = sshll.u32 %s2098_s18, 6 }
  0x18   : > { %1886 = dma.vmem_to_smem (!%p1884_p4), %s147_s29, 16, %s2104_s7, [#allocation9]  }
  0x19   : > { %p40_p10 = scmp.eq.s32.totalorder %s37_s9, 0  ;;  %s172_s13 = scalar_lea.hbm %s2965_s0, %s1873_s10 }
  0x1a   : > { %s164_s2 = scalar_lea.vmem [#allocation6], %s1756_s8  ;;  %s173_s27 = sshll.u32 %s172_s13, 4  ;;  %s174_s27 = int_to_ptr.hbm [resolvable:$true] %s173_s27 }
  0x1b   : > { %s175_s20 = sshll.u32 %s164_s2, 4  ;;  %s161_s28 = scalar_lea.sflag [#allocation7], %s160_s6  ;;  %s176_s20 = int_to_ptr.vmem [resolvable:$true] %s175_s20 }
  0x1c   : > { %s2235_s23 = scalar_select %p40_p10, %s2090_s16, %s42_s21  }
  0x1d   : > { %s2105_s29 = smov 128   ;;  %s2106_s7 = smov 8  }
  0x1e   : > { %1890 = dma.hbm_to_vmem [thread:$0]  (!%p2216_p2), %s174_s27, 1024, %s176_s20, %s161_s28, %s2105_s29, %s2105_s29, %s2106_s7  }
  0x1f   : > { %187 = sbr.rel (%p2206_p12) target bundleno = 776 (0x308), region = 32  ;;  %s2242_s9 = sand.u32 (!%p2206_p12), 1, %s2086_s15  }
  0x20   : > { %s1760_s8 = sshll.u32 (!%p2206_p12), %s2242_s9, 6  ;;  %s190_s21 = scalar_lea.sflag (!%p2206_p12), [#allocation7], %s2242_s9 }
  0x21   : > { %s2246_s10 = scalar_lea.vmem (!%p2206_p12), [#allocation6], %s1760_s8 }
  0x24   : > { %2069 = dma.done.wait (%p2189_p7), %s190_s21, 1024  }
  0x25   : > { %2071 = vsyncadd (%p2189_p7), %s190_s21, 4294966272 }
  0x26   : > { %2073 = dma.done.wait (%p2179_p3), [#allocation9], 16  }
  0x27   : > { %2075 = vsyncadd (%p2179_p3), [#allocation9], 4294967280 }
  0x28   : > { %204 = sfence }
  0x29   : > { %vm228_vm0 = vcmask 130048   ;;  %v2107_v0 = vmov -inf   ;;  %v2108_v1 = vmov 0.0   ;;  %v237_v2 = vld [vmem:[%s2246_s10] sm:$0xff]  ;;  %v238_v3 = vld [vmem:[%s2246_s10 + $0x8] sm:$0xff]  ;;  %v1763_v5 = vld [vmem:[%s2246_s10 + $0x10] sm:$0xff] }
  0x2a   : > { %229 = vst.msk [vmem:[#allocation3] sm:$0xff] %vm228_vm0, %v2107_v0  ;;  %v1764_v8 = vld [vmem:[%s2246_s10 + $0x18] sm:$0xff]  ;;  %v1765_v9 = vld [vmem:[%s2246_s10 + $0x20] sm:$0xff]  ;;  %v1766_v13 = vld [vmem:[%s2246_s10 + $0x28] sm:$0xff]  ;;  %s2109_s22 = smov 3   ;;  %vm284_vm1 = vcmask 23552  }
  0x2b   : > { %230 = vst.msk [vmem:[#allocation3 + $0x8] sm:$0xff] %vm228_vm0, %v2107_v0  ;;  %v1767_v15 = vld [vmem:[%s2246_s10 + $0x30] sm:$0xff]  ;;  %v1768_v18 = vld [vmem:[%s2246_s10 + $0x38] sm:$0xff]  ;;  %vm287_vm2 = vcmask 154624   ;;  %s1770_s24 = sld [smem:[#allocation10 + $0x2]]  ;;  %s2110_s6 = smov 126  }
  0x2c   : > { %231 = vst.msk [vmem:[#allocation4] sm:$0xff] %vm228_vm0, %v2108_v1  ;;  %s1769_s30 = sld [smem:[#allocation10 + $0x1]]  ;;  %s2111_s11 = smov 127  }
  0x2d   : > { %274 = vst [vmem:[#allocation2] sm:$0x7] %v2108_v1  ;;  %s1771_s4 = sld [smem:[#allocation10 + $0x3]]  ;;  %s2112_s2 = smov 125  }
  0x2e   : > { %275 = vst [vmem:[#allocation2 + $0x13] sm:$0x1f] %v2108_v1  ;;  %s1773_s12 = sld [smem:[#allocation10 + $0x5]]  ;;  %s2113_s27 = smov 123  }
  0x2f   : > { %293 = vst [vmem:[#allocation2 + $0x18] sm:$0x7] %v2108_v1  ;;  %s1772_s13 = sld [smem:[#allocation10 + $0x4]]  ;;  %s2114_s28 = smov 124  }
  0x30   : > { %294 = vst [vmem:[#allocation2 + $0x2b] sm:$0x1f] %v2108_v1  ;;  %s1774_s20 = sld [smem:[#allocation10 + $0x6]]  ;;  %s2115_s8 = smov 122  }
  0x31   : > { %v233_v4 = vld [vmem:[#allocation3] sm:$0xff]  ;;  %232 = vst.msk [vmem:[#allocation4 + $0x8] sm:$0xff] %vm228_vm0, %v2108_v1  ;;  %v334_v37 = vstv %s1770_s24  ;;  %s1777_s29 = sld [smem:[#allocation10 + $0x9]] }
  0x32   : > { %v239_v6 = vmax.f32 %v233_v4, %v237_v2  ;;  %v234_v7 = vld [vmem:[#allocation3 + $0x8] sm:$0xff]  ;;  %v320_v38 = vstv %s1769_s30  ;;  %s1776_s7 = sld [smem:[#allocation10 + $0x8]] }
  0x33   : > { %v240_v10 = vmax.f32 %v234_v7, %v238_v3  ;;  %v235_v11 = vld [vmem:[#allocation4] sm:$0xff]  ;;  %v348_v45 = vstv %s1771_s4  ;;  %s1778_s21 = sld [smem:[#allocation10 + $0xa]] }
  0x34   : > { %v246_v12 = vmax.f32 %v239_v6, %v1763_v5  ;;  %v241_v14 = vadd.f32 %v237_v2, %v235_v11  ;;  %v376_v48 = vstv %s1773_s12  ;;  %s1780_s10 = sld [smem:[#allocation10 + $0xc]] }
  0x35   : > { %v247_v16 = vmax.f32 %v240_v10, %v1764_v8  ;;  %v362_v49 = vstv %s1772_s13  ;;  %s1781_s24 = sld [smem:[#allocation10 + $0xd]] }
  0x36   : > { %v253_v17 = vmax.f32 %v246_v12, %v1765_v9  ;;  %v248_v19 = vadd.f32 %v1763_v5, %v241_v14  ;;  %v390_v53 = vstv %s1774_s20  ;;  %s1784_s30 = sld [smem:[#allocation10 + $0x10]] }
  0x37   : > { %v254_v20 = vmax.f32 %v247_v16, %v1766_v13  ;;  %v426_v58 = vstv %s1777_s29  ;;  %s1783_s4 = sld [smem:[#allocation10 + $0xf]] }
  0x38   : > { %v260_v21 = vmax.f32 %v253_v17, %v1767_v15  ;;  %v255_v22 = vadd.f32 %v1765_v9, %v248_v19  ;;  %v236_v26 = vld [vmem:[#allocation4 + $0x8] sm:$0xff]  ;;  %v412_v59 = vstv %s1776_s7  ;;  %s1785_s12 = sld [smem:[#allocation10 + $0x11]] }
  0x39   : > { %v261_v23 = vmax.f32 %v254_v20, %v1768_v18  ;;  %v242_v27 = vadd.f32 %v238_v3, %v236_v26  ;;  %v440_v0 = vstv %s1778_s21  ;;  %s1787_s13 = sld [smem:[#allocation10 + $0x13]] }
  0x3a   : > { %278 = vrot.lane.b32.xlu0 %v260_v21, %s2109_s22  ;;  %265 = vst.msk [vmem:[#allocation3] sm:$0xff] %vm228_vm0, %v260_v21  ;;  %v262_v24 = vadd.f32 %v1767_v15, %v255_v22  ;;  %v468_v4 = vstv %s1780_s10  ;;  %s1786_s20 = sld [smem:[#allocation10 + $0x12]] }
  0x3b   : > { %266 = vst.msk [vmem:[#allocation3 + $0x8] sm:$0xff] %vm228_vm0, %v261_v23  ;;  %v249_v28 = vadd.f32 %v1764_v8, %v242_v27  ;;  %v482_v9 = vstv %s1781_s24  ;;  %s1788_s29 = sld [smem:[#allocation10 + $0x14]] }
  0x3c   : > { %v272_v25 = vmul.f32 0.25, %v262_v24  ;;  %267 = vst.msk [vmem:[#allocation4] sm:$0xff] %vm228_vm0, %v262_v24  ;;  %v518_v14 = vstv %s1784_s30  ;;  %s1791_s7 = sld [smem:[#allocation10 + $0x17]] }
  0x3d   : > { %v256_v29 = vadd.f32 %v1766_v13, %v249_v28  ;;  %v504_v15 = vstv %s1783_s4  ;;  %s1790_s21 = sld [smem:[#allocation10 + $0x16]] }
  0x3e   : > { %297 = vrot.lane.b32.xlu1 %v272_v25, %s2109_s22  ;;  %s1792_s10 = sld [smem:[#allocation10 + $0x18]] }
  0x3f   : > { %v263_v30 = vadd.f32 %v1768_v18, %v256_v29  ;;  %v560_v29 = vstv %s1787_s13  ;;  %s1793_s24 = sld [smem:[#allocation10 + $0x19]] }
  0x40   : > { %s313_s30 = sld [smem:[#allocation10]] }
  0x41   : > { %268 = vst.msk [vmem:[#allocation4 + $0x8] sm:$0xff] %vm228_vm0, %v263_v30  ;;  %v273_v31 = vmul.f32 0.25, %v263_v30  ;;  %v546_v30 = vstv %s1786_s20  ;;  %s2389_s4 = sld [smem:[#allocation10 + $0x1b]] }
  0x42   : > { %280 = vrot.lane.b32.xlu0 %v261_v23, %s2109_s22  ;;  %v532_v23 = vstv %s1785_s12  ;;  %s2391_s12 = sld [smem:[#allocation5]] }
  0x43   : > { %s2399_s13 = sld [smem:[#allocation10 + $0x1e]] }
  0x44   : > { %s2401_s20 = sld [smem:[#allocation10 + $0x1d]] }
  0x46   : > { %299 = vrot.lane.b32.xlu1 %v273_v31, %s2109_s22  ;;  %s1779_s22 = sld [smem:[#allocation10 + $0xb]] }
  0x4c   : > { %v454_v5 = vstv %s1779_s22  ;;  %s2380_s22 = sld [smem:[#allocation10 + $0x1a]] }
  0xac   : > { %v279_v32 = vpop.permute.xlu0 %278 }
  0xad   : > { %v285_v33 = vsel %vm284_vm1, 0.0, %v279_v32 }
  0xae   : > { %v2274_v34 = vsel %vm287_vm2, %v285_v33, 0.0 }
  0xaf   : > { %290 = vst [vmem:[#allocation2 + $0x3] sm:$0xff] %v2274_v34 }
  0xb0   : > { %v298_v19 = vpop.permute.xlu1 %297 }
  0xb1   : > { %v303_v20 = vsel %vm284_vm1, 0.0, %v298_v19 }
  0xb2   : > { %v2348_v22 = vsel %vm287_vm2, %v303_v20, 0.0 }
  0xb3   : > { %307 = vst [vmem:[#allocation2 + $0x1b] sm:$0xff] %v2348_v22 }
  0xb4   : > { %v281_v35 = vpop.permute.xlu0 %280 }
  0xb5   : > { %v286_v36 = vsel %vm284_vm1, 0.0, %v281_v35 }
  0xb6   : > { %v2278_v39 = vld [vmem:[#allocation2] sm:$0xff]  ;;  %v2281_v40 = vsel %vm287_vm2, %v286_v36, 0.0  ;;  %v574_v36 = vstv %s1788_s29  ;;  %s2417_s29 = sld [smem:[#allocation10 + $0x1f]] }
  0xb7   : > { %291 = vst [vmem:[#allocation2 + $0xb] sm:$0xff] %v2281_v40  ;;  %v335_v41 = vmul.f32 %v334_v37, %v2278_v39  ;;  %v321_v42 = vmul.f32 %v320_v38, %v2278_v39  ;;  %v377_v50 = vmul.f32 %v376_v48, %v2278_v39  ;;  %v363_v51 = vmul.f32 %v362_v49, %v2278_v39  ;;  %v2308_v57 = vld [vmem:[#allocation2 + $0x1] sm:$0xff] }
  0xb8   : > { %v349_v52 = vmul.f32 %v348_v45, %v2278_v39  ;;  %v427_v60 = vmul.f32 %v426_v58, %v2308_v57  ;;  %v413_v61 = vmul.f32 %v412_v59, %v2308_v57  ;;  %v391_v62 = vmul.f32 %v390_v53, %v2278_v39  ;;  %v2336_v13 = vld [vmem:[#allocation2 + $0x2] sm:$0xff]  ;;  %v300_v27 = vpop.permute.xlu1 %299 }
  0xb9   : > { %339 = vrot.lane.b32.xlu0 %v335_v41, %s2110_s6  ;;  %325 = vrot.lane.b32.xlu2 %v321_v42, %s2111_s11  ;;  %v469_v6 = vmul.f32 %v468_v4, %v2308_v57  ;;  %v455_v7 = vmul.f32 %v454_v5, %v2308_v57  ;;  %v441_v8 = vmul.f32 %v440_v0, %v2308_v57  ;;  %v304_v28 = vsel %vm284_vm1, 0.0, %v300_v27 }
  0xba   : > { %v519_v16 = vmul.f32 %v518_v14, %v2336_v13  ;;  %v505_v17 = vmul.f32 %v504_v15, %v2336_v13  ;;  %v483_v18 = vmul.f32 %v482_v9, %v2308_v57  ;;  %v2359_v31 = vsel %vm287_vm2, %v304_v28, 0.0 }
  0xbb   : > { %308 = vst [vmem:[#allocation2 + $0x23] sm:$0xff] %v2359_v31  ;;  %v561_v32 = vmul.f32 %v560_v29, %v2336_v13  ;;  %v547_v33 = vmul.f32 %v546_v30, %v2336_v13  ;;  %v533_v35 = vmul.f32 %v532_v23, %v2336_v13 }
  0xbe   : > { %v2288_v43 = vld [vmem:[#allocation2 + $0x8] sm:$0xff] }
  0xbf   : > { %v322_v44 = vmul.f32 %v320_v38, %v2288_v43  ;;  %v350_v46 = vmul.f32 %v348_v45, %v2288_v43  ;;  %v336_v47 = vmul.f32 %v334_v37, %v2288_v43  ;;  %v392_v54 = vmul.f32 %v390_v53, %v2288_v43  ;;  %v2316_v63 = vld [vmem:[#allocation2 + $0x9] sm:$0xff] }
  0xc0   : > { %v378_v55 = vmul.f32 %v376_v48, %v2288_v43  ;;  %v364_v56 = vmul.f32 %v362_v49, %v2288_v43  ;;  %v442_v1 = vmul.f32 %v440_v0, %v2316_v63  ;;  %v428_v2 = vmul.f32 %v426_v58, %v2316_v63  ;;  %v2345_v21 = vld [vmem:[#allocation2 + $0xa] sm:$0xff] }
  0xc1   : > { %355 = vrot.lane.b32.xlu0 %v350_v46, %s2112_s2  ;;  %341 = vrot.lane.b32.xlu1 %v336_v47, %s2110_s6  ;;  %v414_v3 = vmul.f32 %v412_v59, %v2316_v63  ;;  %v484_v10 = vmul.f32 %v482_v9, %v2316_v63  ;;  %v470_v11 = vmul.f32 %v468_v4, %v2316_v63  ;;  %v596_v45 = vstv %s1790_s21  ;;  %s2427_s21 = sld [smem:[#allocation10 + $0x21]] }
  0xc2   : > { %327 = vrot.lane.b32.xlu2 %v322_v44, %s2111_s11  ;;  %v456_v12 = vmul.f32 %v454_v5, %v2316_v63  ;;  %v534_v24 = vmul.f32 %v532_v23, %v2345_v21  ;;  %v520_v25 = vmul.f32 %v518_v14, %v2345_v21  ;;  %v506_v26 = vmul.f32 %v504_v15, %v2345_v21 }
  0xc3   : > { %v576_v37 = vmul.f32 %v574_v36, %v2345_v21  ;;  %v562_v38 = vmul.f32 %v560_v29, %v2345_v21  ;;  %v548_v41 = vmul.f32 %v546_v30, %v2345_v21  ;;  %v610_v44 = vstv %s1791_s7  ;;  %s2419_s7 = sld [smem:[#allocation10 + $0x7]]  ;;  %v2429_v29 = vld [vmem:[#allocation2 + $0xc] sm:$0xff] }
  0xc4   : > { %v611_v46 = vmul.f32 %v610_v44, %v2274_v34  ;;  %v597_v47 = vmul.f32 %v596_v45, %v2274_v34  ;;  %v575_v48 = vmul.f32 %v574_v36, %v2336_v13  ;;  %v598_v53 = vmul.f32 %v596_v45, %v2281_v40 }
  0xc5   : > { %v702_v14 = vstv %s2399_s13  ;;  %v688_v15 = vstv %s2401_s20  ;;  %v716_v30 = vstv %s2417_s29  ;;  %s2478_s13 = sld [smem:[#allocation10 + $0x28]] }
  0xc6   : > { %v718_v36 = vmul.f32 %v716_v30, %v2429_v29  ;;  %s2483_s20 = sld [smem:[#allocation10 + $0x27]] }
  0xc7   : > { %s2495_s29 = sld [smem:[#allocation10 + $0x29]] }
  0xc9   : > { %381 = vrot.lane.b32.xlu0 %v377_v50, %s2113_s27  ;;  %367 = vrot.lane.b32.xlu1 %v363_v51, %s2114_s28  ;;  %v624_v50 = vstv %s1792_s10  ;;  %s2432_s10 = sld [smem:[#allocation10 + $0x20]] }
  0xca   : > { %353 = vrot.lane.b32.xlu2 %v349_v52, %s2112_s2  ;;  %v626_v51 = vmul.f32 %v624_v50, %v2281_v40  ;;  %v612_v52 = vmul.f32 %v610_v44, %v2281_v40 }
  0xd1   : > { %397 = vrot.lane.b32.xlu0 %v392_v54, %s2115_s8  ;;  %383 = vrot.lane.b32.xlu1 %v378_v55, %s2113_s27  ;;  %v652_v55 = vstv %s2380_s22  ;;  %s2444_s22 = sld [smem:[#allocation10 + $0x22]] }
  0xd2   : > { %369 = vrot.lane.b32.xlu2 %v364_v56, %s2114_s28  ;;  %v638_v56 = vstv %s1793_s24  ;;  %v653_v58 = vmul.f32 %v652_v55, %v2274_v34  ;;  %v654_v5 = vmul.f32 %v652_v55, %v2281_v40  ;;  %s2453_s24 = sld [smem:[#allocation10 + $0x25]] }
  0xd3   : > { %v639_v59 = vmul.f32 %v638_v56, %v2274_v34 }
  0xd9   : > { %431 = vrot.lane.b32.xlu0 %v427_v60, %s2110_s6  ;;  %417 = vrot.lane.b32.xlu1 %v413_v61, %s2111_s11  ;;  %v625_v60 = vmul.f32 %v624_v50, %v2274_v34  ;;  %v314_v61 = vstv %s313_s30  ;;  %v744_v50 = vstv %s2427_s21  ;;  %s2456_s30 = sld [smem:[#allocation10 + $0x24]] }
  0xda   : > { %395 = vrot.lane.b32.xlu2 %v391_v62, %s2115_s8  ;;  %s2507_s21 = sld [smem:[#allocation10 + $0x2b]] }
  0xe1   : > { %447 = vrot.lane.b32.xlu0 %v442_v1, %s2112_s2  ;;  %433 = vrot.lane.b32.xlu1 %v428_v2, %s2110_s6  ;;  %v315_v1 = vmul.f32 %v314_v61, %v2278_v39  ;;  %v666_v2 = vstv %s2389_s4  ;;  %s2468_s4 = sld [smem:[#allocation10 + $0x26]] }
  0xe2   : > { %419 = vrot.lane.b32.xlu2 %v414_v3, %s2111_s11  ;;  %v310_v3 = vstv %s2391_s12  ;;  %v668_v4 = vmul.f32 %v666_v2, %v2281_v40  ;;  %v667_v20 = vmul.f32 %v666_v2, %v2274_v34  ;;  %s2470_s12 = sld [smem:[#allocation10 + $0xe]] }
  0xe9   : > { %473 = vrot.lane.b32.xlu0 %v469_v6, %s2113_s27  ;;  %459 = vrot.lane.b32.xlu1 %v455_v7, %s2114_s28  ;;  %v640_v6 = vmul.f32 %v638_v56, %v2281_v40  ;;  %v317_v7 = vadd.f32 %v315_v1, %v310_v3 }
  0xea   : > { %445 = vrot.lane.b32.xlu2 %v441_v8, %s2112_s2  ;;  %v316_v8 = vmul.f32 %v314_v61, %v2288_v43 }
  0xf1   : > { %489 = vrot.lane.b32.xlu0 %v484_v10, %s2115_s8  ;;  %475 = vrot.lane.b32.xlu1 %v470_v11, %s2113_s27 }
  0xf2   : > { %461 = vrot.lane.b32.xlu2 %v456_v12, %s2114_s28  ;;  %v2413_v12 = vld [vmem:[#allocation2 + $0x4] sm:$0xff] }
  0xf3   : > { %v689_v43 = vmul.f32 %v688_v15, %v2413_v12  ;;  %v717_v56 = vmul.f32 %v716_v30, %v2413_v12 }
  0xf9   : > { %523 = vrot.lane.b32.xlu0 %v519_v16, %s2110_s6  ;;  %509 = vrot.lane.b32.xlu1 %v505_v17, %s2111_s11  ;;  %v318_v16 = vadd.f32 %v316_v8, %v310_v3 }
  0xfa   : > { %487 = vrot.lane.b32.xlu2 %v483_v18, %s2115_s8  ;;  %v703_v18 = vmul.f32 %v702_v14, %v2413_v12 }
 0x101   : > { %539 = vrot.lane.b32.xlu0 %v534_v24, %s2112_s2  ;;  %525 = vrot.lane.b32.xlu1 %v520_v25, %s2110_s6 }
 0x102   : > { %511 = vrot.lane.b32.xlu2 %v506_v26, %s2111_s11 }
 0x109   : > { %565 = vrot.lane.b32.xlu0 %v561_v32, %s2113_s27  ;;  %551 = vrot.lane.b32.xlu1 %v547_v33, %s2114_s28  ;;  %v406_v32 = vstv %s2419_s7  ;;  %s2504_s7 = sld [smem:[#allocation10 + $0x2c]] }
 0x10a   : > { %537 = vrot.lane.b32.xlu2 %v533_v35, %s2112_s2 }
 0x111   : > { %581 = vrot.lane.b32.xlu0 %v576_v37, %s2115_s8  ;;  %567 = vrot.lane.b32.xlu1 %v562_v38, %s2113_s27  ;;  %v704_v37 = vmul.f32 %v702_v14, %v2429_v29  ;;  %v407_v38 = vmul.f32 %v406_v32, %v2308_v57  ;;  %v408_v57 = vmul.f32 %v406_v32, %v2316_v63 }
 0x112   : > { %553 = vrot.lane.b32.xlu2 %v548_v41, %s2114_s28 }
 0x113   : > { %v326_v42 = vpop.permute.xlu2 %325 }
 0x114   : > { %v331_v10 = vadd.f32 %v326_v42, %v317_v7  ;;  %v690_v42 = vmul.f32 %v688_v15, %v2429_v29  ;;  %v780_v7 = vstv %s2456_s30  ;;  %s2534_s30 = sld [smem:[#allocation10 + $0x2e]] }
 0x119   : > { %615 = vrot.lane.b32.xlu0 %v611_v46, %s2110_s6  ;;  %601 = vrot.lane.b32.xlu1 %v597_v47, %s2111_s11 }
 0x11a   : > { %579 = vrot.lane.b32.xlu2 %v575_v48, %s2115_s8 }
 0x11c   : > { %v328_v49 = vpop.permute.xlu2 %327 }
 0x11d   : > { %v332_v19 = vadd.f32 %v328_v49, %v318_v16 }
 0x121   : > { %631 = vrot.lane.b32.xlu0 %v626_v51, %s2112_s2  ;;  %617 = vrot.lane.b32.xlu1 %v612_v52, %s2110_s6  ;;  %v730_v51 = vstv %s2432_s10  ;;  %s2519_s10 = sld [smem:[#allocation10 + $0x2d]] }
 0x122   : > { %603 = vrot.lane.b32.xlu2 %v598_v53, %s2111_s11  ;;  %v745_v53 = vmul.f32 %v744_v50, %v2413_v12 }
 0x124   : > { %v354_v54 = vpop.permute.xlu2 %353 }
 0x129   : > { %657 = vrot.lane.b32.xlu0 %v653_v58, %s2113_s27  ;;  %643 = vrot.lane.b32.xlu1 %v639_v59, %s2114_s28 }
 0x12a   : > { %629 = vrot.lane.b32.xlu2 %v625_v60, %s2112_s2  ;;  %v758_v60 = vstv %s2444_s22  ;;  %s2521_s22 = sld [smem:[#allocation10 + $0x15]] }
 0x12b   : > { %v340_v62 = vpop.permute.xlu0 %339  ;;  %v760_v61 = vmul.f32 %v758_v60, %v2429_v29 }
 0x12c   : > { %v370_v0 = vpop.permute.xlu2 %369  ;;  %v345_v17 = vadd.f32 %v340_v62, %v331_v10  ;;  %v746_v62 = vmul.f32 %v744_v50, %v2429_v29 }
 0x12e   : > { %v359_v23 = vadd.f32 %v354_v54, %v345_v17  ;;  %v731_v54 = vmul.f32 %v730_v51, %v2413_v12 }
 0x131   : > { %673 = vrot.lane.b32.xlu0 %v668_v4, %s2115_s8  ;;  %659 = vrot.lane.b32.xlu1 %v654_v5, %s2113_s27  ;;  %v2464_v5 = vld [vmem:[#allocation2 + $0x5] sm:$0xff] }
 0x132   : > { %645 = vrot.lane.b32.xlu2 %v640_v6, %s2114_s28  ;;  %v794_v6 = vstv %s2453_s24  ;;  %s2529_s24 = sld [smem:[#allocation10 + $0x2f]] }
 0x133   : > { %v342_v39 = vpop.permute.xlu1 %341  ;;  %v356_v9 = vpop.permute.xlu0 %355 }
 0x134   : > { %v396_v11 = vpop.permute.xlu2 %395  ;;  %v346_v24 = vadd.f32 %v342_v39, %v332_v19  ;;  %v795_v39 = vmul.f32 %v794_v6, %v2464_v5  ;;  %v2480_v19 = vld [vmem:[#allocation2 + $0xd] sm:$0xff] }
 0x135   : > { %v782_v32 = vmul.f32 %v780_v7, %v2480_v19 }
 0x136   : > { %v360_v33 = vadd.f32 %v356_v9, %v346_v24  ;;  %v781_v9 = vmul.f32 %v780_v7, %v2464_v5 }
 0x138   : > { %v374_v44 = vadd.f32 %v370_v0, %v360_v33  ;;  %v732_v0 = vmul.f32 %v730_v51, %v2429_v29 }
 0x139   : > { %707 = vrot.lane.b32.xlu0 %v703_v18, %s2110_s6  ;;  %693 = vrot.lane.b32.xlu1 %v689_v43, %s2111_s11 }
 0x13a   : > { %671 = vrot.lane.b32.xlu2 %v667_v20, %s2115_s8  ;;  %v808_v20 = vstv %s2468_s4  ;;  %s2546_s4 = sld [smem:[#allocation10 + $0x30]] }
 0x13b   : > { %v368_v25 = vpop.permute.xlu1 %367  ;;  %v382_v26 = vpop.permute.xlu0 %381 }
 0x13c   : > { %v373_v27 = vadd.f32 %v368_v25, %v359_v23  ;;  %v420_v28 = vpop.permute.xlu2 %419  ;;  %v498_v23 = vstv %s2470_s12  ;;  %s2555_s12 = sld [smem:[#allocation10 + $0x33]] }
 0x13e   : > { %v387_v35 = vadd.f32 %v382_v26, %v373_v27  ;;  %v810_v26 = vmul.f32 %v808_v20, %v2480_v19  ;;  %v796_v27 = vmul.f32 %v794_v6, %v2480_v19 }
 0x140   : > { %v401_v41 = vadd.f32 %v396_v11, %v387_v35  ;;  %v759_v11 = vmul.f32 %v758_v60, %v2413_v12 }
 0x141   : > { %723 = vrot.lane.b32.xlu0 %v718_v36, %s2112_s2  ;;  %709 = vrot.lane.b32.xlu1 %v704_v37, %s2110_s6 }
 0x142   : > { %v409_v45 = vadd.f32 %v407_v38, %v401_v41  ;;  %695 = vrot.lane.b32.xlu2 %v690_v42, %s2111_s11  ;;  %v836_v42 = vstv %s2478_s13  ;;  %s2558_s13 = sld [smem:[#allocation10 + $0x32]] }
 0x143   : > { %v384_v46 = vpop.permute.xlu1 %383  ;;  %v398_v47 = vpop.permute.xlu0 %397 }
 0x144   : > { %v388_v48 = vadd.f32 %v384_v46, %v374_v44  ;;  %v446_v49 = vpop.permute.xlu2 %445  ;;  %v822_v44 = vstv %s2483_s20  ;;  %v837_v46 = vmul.f32 %v836_v42, %v2464_v5  ;;  %s2570_s20 = sld [smem:[#allocation10 + $0x34]] }
 0x146   : > { %v402_v52 = vadd.f32 %v398_v47, %v388_v48  ;;  %v823_v47 = vmul.f32 %v822_v44, %v2464_v5 }
 0x148   : > { %v410_v55 = vadd.f32 %v408_v57, %v402_v52 }
 0x149   : > { %749 = vrot.lane.b32.xlu0 %v745_v53, %s2113_s27  ;;  %735 = vrot.lane.b32.xlu1 %v731_v54, %s2114_s28  ;;  %v850_v53 = vstv %s2495_s29  ;;  %s2572_s29 = sld [smem:[#allocation10 + $0x1c]] }
 0x14a   : > { %721 = vrot.lane.b32.xlu2 %v717_v56, %s2112_s2  ;;  %v424_v10 = vadd.f32 %v420_v28, %v410_v55  ;;  %v499_v28 = vmul.f32 %v498_v23, %v2336_v13  ;;  %v500_v13 = vmul.f32 %v498_v23, %v2345_v21  ;;  %v852_v55 = vmul.f32 %v850_v53, %v2480_v19 }
 0x14b   : > { %v418_v58 = vpop.permute.xlu1 %417  ;;  %v432_v59 = vpop.permute.xlu0 %431  ;;  %v838_v56 = vmul.f32 %v836_v42, %v2480_v19 }
 0x14c   : > { %v462_v63 = vpop.permute.xlu2 %461  ;;  %v423_v1 = vadd.f32 %v418_v58, %v409_v45 }
 0x14e   : > { %v437_v8 = vadd.f32 %v432_v59, %v423_v1  ;;  %v824_v59 = vmul.f32 %v822_v44, %v2480_v19  ;;  %v886_v1 = vstv %s2504_s7  ;;  %s2580_s7 = sld [smem:[#allocation10 + $0x36]] }
 0x150   : > { %v451_v14 = vadd.f32 %v446_v49, %v437_v8  ;;  %v809_v49 = vmul.f32 %v808_v20, %v2464_v5  ;;  %v851_v8 = vmul.f32 %v850_v53, %v2464_v5 }
 0x151   : > { %765 = vrot.lane.b32.xlu0 %v760_v61, %s2115_s8  ;;  %751 = vrot.lane.b32.xlu1 %v746_v62, %s2113_s27 }
 0x152   : > { %737 = vrot.lane.b32.xlu2 %v732_v0, %s2114_s28  ;;  %v2515_v0 = vld [vmem:[#allocation2 + $0x6] sm:$0xff] }
 0x153   : > { %v434_v2 = vpop.permute.xlu1 %433  ;;  %v448_v3 = vpop.permute.xlu0 %447 }
 0x154   : > { %v488_v4 = vpop.permute.xlu2 %487  ;;  %v438_v15 = vadd.f32 %v434_v2, %v424_v10  ;;  %v872_v2 = vstv %s2507_s21  ;;  %s2585_s21 = sld [smem:[#allocation10 + $0x35]] }
 0x155   : > { %v873_v6 = vmul.f32 %v872_v2, %v2515_v0 }
 0x156   : > { %v452_v24 = vadd.f32 %v448_v3, %v438_v15  ;;  %v900_v15 = vstv %s2519_s10  ;;  %s2597_s10 = sld [smem:[#allocation10 + $0x37]] }
 0x158   : > { %v466_v33 = vadd.f32 %v462_v63, %v452_v24 }
 0x159   : > { %799 = vrot.lane.b32.xlu0 %v795_v39, %s2110_s6  ;;  %785 = vrot.lane.b32.xlu1 %v781_v9, %s2111_s11 }
 0x15a   : > { %763 = vrot.lane.b32.xlu2 %v759_v11, %s2115_s8 }
 0x15b   : > { %v460_v16 = vpop.permute.xlu1 %459  ;;  %v474_v17 = vpop.permute.xlu0 %473 }
 0x15c   : > { %v465_v18 = vadd.f32 %v460_v16, %v451_v14  ;;  %v512_v43 = vpop.permute.xlu2 %511  ;;  %v2531_v14 = vld [vmem:[#allocation2 + $0xe] sm:$0xff]  ;;  %v590_v16 = vstv %s2521_s22  ;;  %s2606_s22 = sld [smem:[#allocation10 + $0x3a]] }
 0x15d   : > { %v591_v20 = vmul.f32 %v590_v16, %v2274_v34  ;;  %v874_v24 = vmul.f32 %v872_v2, %v2531_v14  ;;  %v592_v34 = vmul.f32 %v590_v16, %v2281_v40 }
 0x15e   : > { %v479_v25 = vadd.f32 %v474_v17, %v465_v18  ;;  %v902_v18 = vmul.f32 %v900_v15, %v2531_v14 }
 0x160   : > { %v493_v30 = vadd.f32 %v488_v4, %v479_v25  ;;  %v887_v4 = vmul.f32 %v886_v1, %v2515_v0 }
 0x161   : > { %815 = vrot.lane.b32.xlu0 %v810_v26, %s2112_s2  ;;  %801 = vrot.lane.b32.xlu1 %v796_v27, %s2110_s6 }
 0x162   : > { %v501_v35 = vadd.f32 %v499_v28, %v493_v30  ;;  %787 = vrot.lane.b32.xlu2 %v782_v32, %s2111_s11  ;;  %v928_v32 = vstv %s2529_s24  ;;  %s2609_s24 = sld [smem:[#allocation10 + $0x39]] }
 0x163   : > { %v476_v36 = vpop.permute.xlu1 %475  ;;  %v490_v37 = vpop.permute.xlu0 %489 }
 0x164   : > { %v480_v38 = vadd.f32 %v476_v36, %v466_v33  ;;  %v538_v41 = vpop.permute.xlu2 %537  ;;  %v914_v33 = vstv %s2534_s30  ;;  %v929_v36 = vmul.f32 %v928_v32, %v2515_v0  ;;  %s2621_s30 = sld [smem:[#allocation10 + $0x3b]] }
 0x166   : > { %v494_v45 = vadd.f32 %v490_v37, %v480_v38  ;;  %v915_v37 = vmul.f32 %v914_v33, %v2515_v0 }
 0x168   : > { %v502_v48 = vadd.f32 %v500_v13, %v494_v45 }
 0x169   : > { %841 = vrot.lane.b32.xlu0 %v837_v46, %s2113_s27  ;;  %827 = vrot.lane.b32.xlu1 %v823_v47, %s2114_s28  ;;  %v942_v46 = vstv %s2546_s4  ;;  %s2623_s4 = sld [smem:[#allocation10 + $0x23]] }
 0x16a   : > { %v516_v50 = vadd.f32 %v512_v43, %v502_v48  ;;  %813 = vrot.lane.b32.xlu2 %v809_v49, %s2112_s2  ;;  %v888_v43 = vmul.f32 %v886_v1, %v2531_v14  ;;  %v944_v48 = vmul.f32 %v942_v46, %v2531_v14  ;;  %v930_v49 = vmul.f32 %v928_v32, %v2531_v14 }
 0x16b   : > { %v510_v51 = vpop.permute.xlu1 %509  ;;  %v524_v57 = vpop.permute.xlu0 %523 }
 0x16c   : > { %v515_v21 = vadd.f32 %v510_v51, %v501_v35  ;;  %v554_v52 = vpop.permute.xlu2 %553  ;;  %v916_v51 = vmul.f32 %v914_v33, %v2531_v14 }
 0x16e   : > { %v529_v54 = vadd.f32 %v524_v57, %v515_v21 }
 0x170   : > { %v543_v58 = vadd.f32 %v538_v41, %v529_v54  ;;  %v901_v41 = vmul.f32 %v900_v15, %v2515_v0  ;;  %v2566_v54 = vld [vmem:[#allocation2 + $0x18] sm:$0xff] }
 0x171   : > { %857 = vrot.lane.b32.xlu0 %v852_v55, %s2115_s8  ;;  %843 = vrot.lane.b32.xlu1 %v838_v56, %s2113_s27  ;;  %v978_v55 = vstv %s2555_s12  ;;  %v964_v56 = vstv %s2558_s13  ;;  %s2631_s12 = sld [smem:[#allocation10 + $0x3d]] }
 0x172   : > { %829 = vrot.lane.b32.xlu2 %v824_v59, %s2114_s28  ;;  %v979_v59 = vmul.f32 %v978_v55, %v2566_v54  ;;  %s2636_s13 = sld [smem:[#allocation10 + $0x3c]] }
 0x173   : > { %v526_v63 = vpop.permute.xlu1 %525  ;;  %v540_v60 = vpop.permute.xlu0 %539 }
 0x174   : > { %v530_v61 = vadd.f32 %v526_v63, %v516_v50  ;;  %v580_v62 = vpop.permute.xlu2 %579  ;;  %v965_v63 = vmul.f32 %v964_v56, %v2566_v54 }
 0x176   : > { %v544_v3 = vadd.f32 %v540_v60, %v530_v61  ;;  %v943_v61 = vmul.f32 %v942_v46, %v2515_v0 }
 0x178   : > { %v558_v7 = vadd.f32 %v554_v52, %v544_v3 }
 0x179   : > { %891 = vrot.lane.b32.xlu0 %v887_v4, %s2110_s6  ;;  %877 = vrot.lane.b32.xlu1 %v873_v6, %s2111_s11  ;;  %v2582_v4 = vld [vmem:[#allocation2 + $0x20] sm:$0xff]  ;;  %v992_v6 = vstv %s2570_s20  ;;  %s2648_s20 = sld [smem:[#allocation10 + $0x3e]] }
 0x17a   : > { %855 = vrot.lane.b32.xlu2 %v851_v8, %s2115_s8  ;;  %v966_v15 = vmul.f32 %v964_v56, %v2582_v4 }
 0x17b   : > { %v552_v39 = vpop.permute.xlu1 %551  ;;  %v566_v9 = vpop.permute.xlu0 %565 }
 0x17c   : > { %v557_v10 = vadd.f32 %v552_v39, %v543_v58  ;;  %v604_v11 = vpop.permute.xlu2 %603  ;;  %v994_v39 = vmul.f32 %v992_v6, %v2582_v4 }
 0x17e   : > { %v571_v17 = vadd.f32 %v566_v9, %v557_v10  ;;  %v980_v9 = vmul.f32 %v978_v55, %v2582_v4 }
 0x180   : > { %v585_v23 = vadd.f32 %v580_v62, %v571_v17 }
 0x181   : > { %907 = vrot.lane.b32.xlu0 %v902_v18, %s2112_s2  ;;  %893 = vrot.lane.b32.xlu1 %v888_v43, %s2110_s6 }
 0x182   : > { %v593_v25 = vadd.f32 %v591_v20, %v585_v23  ;;  %879 = vrot.lane.b32.xlu2 %v874_v24, %s2111_s11  ;;  %v1020_v23 = vstv %s2580_s7  ;;  %v1006_v24 = vstv %s2585_s21  ;;  %s2660_s7 = sld [smem:[#allocation10 + $0x40]] }
 0x183   : > { %v568_v26 = vpop.permute.xlu1 %567  ;;  %v582_v27 = vpop.permute.xlu0 %581  ;;  %s2672_s21 = sld [smem:[#allocation10 + $0x42]] }
 0x184   : > { %v572_v28 = vadd.f32 %v568_v26, %v558_v7  ;;  %v630_v30 = vpop.permute.xlu2 %629  ;;  %v682_v7 = vstv %s2572_s29  ;;  %v1021_v26 = vmul.f32 %v1020_v23, %v2566_v54  ;;  %s2657_s29 = sld [smem:[#allocation10 + $0x41]] }
 0x185   : > { %v683_v10 = vmul.f32 %v682_v7, %v2413_v12  ;;  %v684_v12 = vmul.f32 %v682_v7, %v2429_v29 }
 0x186   : > { %v586_v35 = vadd.f32 %v582_v27, %v572_v28  ;;  %v1007_v27 = vmul.f32 %v1006_v24, %v2566_v54 }
 0x188   : > { %v594_v38 = vadd.f32 %v592_v34, %v586_v35 }
 0x189   : > { %933 = vrot.lane.b32.xlu0 %v929_v36, %s2113_s27  ;;  %919 = vrot.lane.b32.xlu1 %v915_v37, %s2114_s28  ;;  %v1034_v36 = vstv %s2597_s10  ;;  %s2674_s10 = sld [smem:[#allocation10 + $0x2a]] }
 0x18a   : > { %v608_v42 = vadd.f32 %v604_v11, %v594_v38  ;;  %905 = vrot.lane.b32.xlu2 %v901_v41, %s2112_s2  ;;  %v1036_v38 = vmul.f32 %v1034_v36, %v2582_v4  ;;  %v1022_v41 = vmul.f32 %v1020_v23, %v2582_v4 }
 0x18b   : > { %v602_v44 = vpop.permute.xlu1 %601  ;;  %v616_v13 = vpop.permute.xlu0 %615 }
 0x18c   : > { %v607_v40 = vadd.f32 %v602_v44, %v593_v25  ;;  %v646_v45 = vpop.permute.xlu2 %645  ;;  %v1008_v44 = vmul.f32 %v1006_v24, %v2582_v4 }
 0x18e   : > { %v621_v47 = vadd.f32 %v616_v13, %v607_v40 }
 0x190   : > { %v635_v50 = vadd.f32 %v630_v30, %v621_v47  ;;  %v993_v30 = vmul.f32 %v992_v6, %v2566_v54  ;;  %v2617_v47 = vld [vmem:[#allocation2 + $0x19] sm:$0xff] }
 0x191   : > { %949 = vrot.lane.b32.xlu0 %v944_v48, %s2115_s8  ;;  %935 = vrot.lane.b32.xlu1 %v930_v49, %s2113_s27  ;;  %v1070_v48 = vstv %s2606_s22  ;;  %v1056_v49 = vstv %s2609_s24  ;;  %s2682_s22 = sld [smem:[#allocation10 + $0x44]] }
 0x192   : > { %921 = vrot.lane.b32.xlu2 %v916_v51, %s2114_s28  ;;  %v1071_v51 = vmul.f32 %v1070_v48, %v2617_v47  ;;  %s2687_s24 = sld [smem:[#allocation10 + $0x43]] }
 0x193   : > { %v618_v57 = vpop.permute.xlu1 %617  ;;  %v632_v21 = vpop.permute.xlu0 %631 }
 0x194   : > { %v622_v52 = vadd.f32 %v618_v57, %v608_v42  ;;  %v672_v53 = vpop.permute.xlu2 %671  ;;  %v1057_v57 = vmul.f32 %v1056_v49, %v2617_v47 }
 0x196   : > { %v636_v58 = vadd.f32 %v632_v21, %v622_v52  ;;  %v1035_v52 = vmul.f32 %v1034_v36, %v2566_v54 }
 0x198   : > { %v650_v60 = vadd.f32 %v646_v45, %v636_v58 }
 0x199   : > { %983 = vrot.lane.b32.xlu0 %v979_v59, %s2110_s6  ;;  %969 = vrot.lane.b32.xlu1 %v965_v63, %s2111_s11  ;;  %v2633_v59 = vld [vmem:[#allocation2 + $0x21] sm:$0xff]  ;;  %v1084_v63 = vstv %s2621_s30  ;;  %s2699_s30 = sld [smem:[#allocation10 + $0x45]] }
 0x19a   : > { %947 = vrot.lane.b32.xlu2 %v943_v61, %s2115_s8  ;;  %v1058_v6 = vmul.f32 %v1056_v49, %v2633_v59 }
 0x19b   : > { %v644_v62 = vpop.permute.xlu1 %643  ;;  %v658_v1 = vpop.permute.xlu0 %657 }
 0x19c   : > { %v649_v2 = vadd.f32 %v644_v62, %v635_v50  ;;  %v696_v3 = vpop.permute.xlu2 %695  ;;  %v1086_v62 = vmul.f32 %v1084_v63, %v2633_v59 }
 0x19e   : > { %v663_v8 = vadd.f32 %v658_v1, %v649_v2  ;;  %v1072_v1 = vmul.f32 %v1070_v48, %v2633_v59 }
 0x1a0   : > { %v677_v11 = vadd.f32 %v672_v53, %v663_v8 }
 0x1a1   : > { %999 = vrot.lane.b32.xlu0 %v994_v39, %s2112_s2  ;;  %985 = vrot.lane.b32.xlu1 %v980_v9, %s2110_s6 }
 0x1a2   : > { %v685_v16 = vadd.f32 %v683_v10, %v677_v11  ;;  %971 = vrot.lane.b32.xlu2 %v966_v15, %s2111_s11  ;;  %v1112_v11 = vstv %s2631_s12  ;;  %v1098_v15 = vstv %s2636_s13  ;;  %s2711_s12 = sld [smem:[#allocation10 + $0x47]] }
 0x1a3   : > { %v660_v17 = vpop.permute.xlu1 %659  ;;  %v674_v18 = vpop.permute.xlu0 %673  ;;  %s2721_s13 = sld [smem:[#allocation10 + $0x31]] }
 0x1a4   : > { %v664_v43 = vadd.f32 %v660_v17, %v650_v60  ;;  %v722_v20 = vpop.permute.xlu2 %721  ;;  %v774_v60 = vstv %s2623_s4  ;;  %v1113_v17 = vmul.f32 %v1112_v11, %v2617_v47  ;;  %s2708_s4 = sld [smem:[#allocation10 + $0x48]] }
 0x1a5   : > { %v775_v2 = vmul.f32 %v774_v60, %v2464_v5  ;;  %v776_v5 = vmul.f32 %v774_v60, %v2480_v19 }
 0x1a6   : > { %v678_v25 = vadd.f32 %v674_v18, %v664_v43  ;;  %v1099_v18 = vmul.f32 %v1098_v15, %v2617_v47 }
 0x1a8   : > { %v686_v28 = vadd.f32 %v684_v12, %v678_v25 }
 0x1a9   : > { %1025 = vrot.lane.b32.xlu0 %v1021_v26, %s2113_s27  ;;  %1011 = vrot.lane.b32.xlu1 %v1007_v27, %s2114_s28  ;;  %v1126_v26 = vstv %s2648_s20  ;;  %s2723_s20 = sld [smem:[#allocation10 + $0x49]] }
 0x1aa   : > { %v700_v32 = vadd.f32 %v696_v3, %v686_v28  ;;  %997 = vrot.lane.b32.xlu2 %v993_v30, %s2112_s2  ;;  %v1128_v28 = vmul.f32 %v1126_v26, %v2633_v59  ;;  %v1114_v30 = vmul.f32 %v1112_v11, %v2633_v59 }
 0x1ab   : > { %v694_v33 = vpop.permute.xlu1 %693  ;;  %v708_v34 = vpop.permute.xlu0 %707 }
 0x1ac   : > { %v699_v29 = vadd.f32 %v694_v33, %v685_v16  ;;  %v738_v35 = vpop.permute.xlu2 %737  ;;  %v1100_v33 = vmul.f32 %v1098_v15, %v2633_v59 }
 0x1ae   : > { %v713_v37 = vadd.f32 %v708_v34, %v699_v29 }
 0x1b0   : > { %v727_v42 = vadd.f32 %v722_v20, %v713_v37  ;;  %v1085_v20 = vmul.f32 %v1084_v63, %v2617_v47  ;;  %v2668_v37 = vld [vmem:[#allocation2 + $0x1a] sm:$0xff] }
 0x1b1   : > { %1041 = vrot.lane.b32.xlu0 %v1036_v38, %s2115_s8  ;;  %1027 = vrot.lane.b32.xlu1 %v1022_v41, %s2113_s27  ;;  %v1162_v38 = vstv %s2657_s29  ;;  %v1148_v41 = vstv %s2660_s7  ;;  %s2731_s29 = sld [smem:[#allocation10 + $0x4b]] }
 0x1b2   : > { %1013 = vrot.lane.b32.xlu2 %v1008_v44, %s2114_s28  ;;  %v1163_v44 = vmul.f32 %v1162_v38, %v2668_v37  ;;  %s2733_s7 = sld [smem:[#allocation10 + $0x4a]] }
 0x1b3   : > { %v710_v13 = vpop.permute.xlu1 %709  ;;  %v724_v40 = vpop.permute.xlu0 %723 }
 0x1b4   : > { %v714_v45 = vadd.f32 %v710_v13, %v700_v32  ;;  %v764_v46 = vpop.permute.xlu2 %763  ;;  %v1149_v13 = vmul.f32 %v1148_v41, %v2668_v37 }
 0x1b6   : > { %v728_v50 = vadd.f32 %v724_v40, %v714_v45  ;;  %v1127_v45 = vmul.f32 %v1126_v26, %v2617_v47 }
 0x1b8   : > { %v742_v21 = vadd.f32 %v738_v35, %v728_v50 }
 0x1b9   : > { %1075 = vrot.lane.b32.xlu0 %v1071_v51, %s2110_s6  ;;  %1061 = vrot.lane.b32.xlu1 %v1057_v57, %s2111_s11  ;;  %v2684_v51 = vld [vmem:[#allocation2 + $0x22] sm:$0xff]  ;;  %v1176_v57 = vstv %s2672_s21  ;;  %s2747_s21 = sld [smem:[#allocation10 + $0x4c]] }
 0x1ba   : > { %1039 = vrot.lane.b32.xlu2 %v1035_v52, %s2115_s8  ;;  %v1150_v63 = vmul.f32 %v1148_v41, %v2684_v51 }
 0x1bb   : > { %v736_v53 = vpop.permute.xlu1 %735  ;;  %v750_v55 = vpop.permute.xlu0 %749 }
 0x1bc   : > { %v741_v56 = vadd.f32 %v736_v53, %v727_v42  ;;  %v788_v58 = vpop.permute.xlu2 %787  ;;  %v1178_v53 = vmul.f32 %v1176_v57, %v2684_v51 }
 0x1be   : > { %v755_v61 = vadd.f32 %v750_v55, %v741_v56  ;;  %v1164_v55 = vmul.f32 %v1162_v38, %v2684_v51 }
 0x1c0   : > { %v769_v3 = vadd.f32 %v764_v46, %v755_v61 }
 0x1c1   : > { %1091 = vrot.lane.b32.xlu0 %v1086_v62, %s2112_s2  ;;  %1077 = vrot.lane.b32.xlu1 %v1072_v1, %s2110_s6 }
 0x1c2   : > { %v777_v7 = vadd.f32 %v775_v2, %v769_v3  ;;  %1063 = vrot.lane.b32.xlu2 %v1058_v6, %s2111_s11  ;;  %v1204_v3 = vstv %s2682_s22  ;;  %v1190_v6 = vstv %s2687_s24  ;;  %s2759_s22 = sld [smem:[#allocation10 + $0x4e]] }
 0x1c3   : > { %v752_v8 = vpop.permute.xlu1 %751  ;;  %v766_v39 = vpop.permute.xlu0 %765  ;;  %s2774_s24 = sld [smem:[#allocation10 + $0x38]] }
 0x1c4   : > { %v756_v9 = vadd.f32 %v752_v8, %v742_v21  ;;  %v814_v10 = vpop.permute.xlu2 %813  ;;  %v866_v21 = vstv %s2674_s10  ;;  %v1205_v8 = vmul.f32 %v1204_v3, %v2668_v37  ;;  %s2757_s10 = sld [smem:[#allocation10 + $0x4f]] }
 0x1c5   : > { %v867_v56 = vmul.f32 %v866_v21, %v2515_v0  ;;  %v868_v0 = vmul.f32 %v866_v21, %v2531_v14 }
 0x1c6   : > { %v770_v16 = vadd.f32 %v766_v39, %v756_v9  ;;  %v1191_v39 = vmul.f32 %v1190_v6, %v2668_v37 }
 0x1c8   : > { %v778_v43 = vadd.f32 %v776_v5, %v770_v16 }
 0x1c9   : > { %1117 = vrot.lane.b32.xlu0 %v1113_v17, %s2113_s27  ;;  %1103 = vrot.lane.b32.xlu1 %v1099_v18, %s2114_s28  ;;  %v1218_v17 = vstv %s2699_s30  ;;  %s2776_s30 = sld [smem:[#allocation10 + $0x50]] }
 0x1ca   : > { %v792_v23 = vadd.f32 %v788_v58, %v778_v43  ;;  %1089 = vrot.lane.b32.xlu2 %v1085_v20, %s2112_s2  ;;  %v1220_v43 = vmul.f32 %v1218_v17, %v2684_v51  ;;  %v1206_v20 = vmul.f32 %v1204_v3, %v2684_v51 }
 0x1cb   : > { %v786_v24 = vpop.permute.xlu1 %785  ;;  %v800_v12 = vpop.permute.xlu0 %799 }
 0x1cc   : > { %v791_v19 = vadd.f32 %v786_v24, %v777_v7  ;;  %v830_v25 = vpop.permute.xlu2 %829  ;;  %v1192_v24 = vmul.f32 %v1190_v6, %v2684_v51 }
 0x1ce   : > { %v805_v27 = vadd.f32 %v800_v12, %v791_v19 }
 0x1d0   : > { %v819_v32 = vadd.f32 %v814_v10, %v805_v27  ;;  %v1177_v10 = vmul.f32 %v1176_v57, %v2668_v37  ;;  %v1254_v27 = vstv %s2708_s4  ;;  %s2784_s4 = sld [smem:[#allocation10 + $0x52]] }
 0x1d1   : > { %1133 = vrot.lane.b32.xlu0 %v1128_v28, %s2115_s8  ;;  %1119 = vrot.lane.b32.xlu1 %v1114_v30, %s2113_s27  ;;  %v1240_v28 = vstv %s2711_s12  ;;  %s2788_s12 = sld [smem:[#allocation10 + $0x51]] }
 0x1d2   : > { %1105 = vrot.lane.b32.xlu2 %v1100_v33, %s2114_s28  ;;  %v1241_v33 = vmul.f32 %v1240_v28, %v2348_v22 }
 0x1d3   : > { %v802_v34 = vpop.permute.xlu1 %801  ;;  %v816_v29 = vpop.permute.xlu0 %815 }
 0x1d4   : > { %v806_v35 = vadd.f32 %v802_v34, %v792_v23  ;;  %v856_v36 = vpop.permute.xlu2 %855 }
 0x1d6   : > { %v820_v42 = vadd.f32 %v816_v29, %v806_v35  ;;  %v1219_v29 = vmul.f32 %v1218_v17, %v2668_v37  ;;  %v1346_v17 = vstv %s2757_s10  ;;  %s2835_s10 = sld [smem:[#allocation10 + $0x58]] }
 0x1d8   : > { %v834_v40 = vadd.f32 %v830_v25, %v820_v42  ;;  %v958_v42 = vstv %s2721_s13  ;;  %s2802_s13 = sld [smem:[#allocation10 + $0x53]] }
 0x1d9   : > { %1167 = vrot.lane.b32.xlu0 %v1163_v44, %s2110_s6  ;;  %1153 = vrot.lane.b32.xlu1 %v1149_v13, %s2111_s11  ;;  %v1268_v44 = vstv %s2723_s20  ;;  %s2810_s20 = sld [smem:[#allocation10 + $0x56]] }
 0x1da   : > { %1131 = vrot.lane.b32.xlu2 %v1127_v45, %s2115_s8  ;;  %v1270_v13 = vmul.f32 %v1268_v44, %v2359_v31 }
 0x1db   : > { %v828_v46 = vpop.permute.xlu1 %827  ;;  %v842_v48 = vpop.permute.xlu0 %841 }
 0x1dc   : > { %v833_v49 = vadd.f32 %v828_v46, %v819_v32  ;;  %v880_v50 = vpop.permute.xlu2 %879  ;;  %v1255_v32 = vmul.f32 %v1254_v27, %v2348_v22  ;;  %v1242_v46 = vmul.f32 %v1240_v28, %v2359_v31  ;;  %v2786_v28 = vld [vmem:[#allocation2 + $0x24] sm:$0xff] }
 0x1de   : > { %v847_v52 = vadd.f32 %v842_v48, %v833_v49  ;;  %v959_v48 = vmul.f32 %v958_v42, %v2566_v54 }
 0x1e0   : > { %v861_v58 = vadd.f32 %v856_v36, %v847_v52 }
 0x1e1   : > { %1183 = vrot.lane.b32.xlu0 %v1178_v53, %s2112_s2  ;;  %1169 = vrot.lane.b32.xlu1 %v1164_v55, %s2110_s6  ;;  %v1296_v53 = vstv %s2731_s29  ;;  %v1282_v55 = vstv %s2733_s7  ;;  %s2812_s29 = sld [smem:[#allocation10 + $0x55]] }
 0x1e2   : > { %v869_v60 = vadd.f32 %v867_v56, %v861_v58  ;;  %1155 = vrot.lane.b32.xlu2 %v1150_v63, %s2111_s11  ;;  %v960_v56 = vmul.f32 %v958_v42, %v2582_v4  ;;  %s2825_s7 = sld [smem:[#allocation10 + $0x3f]] }
 0x1e3   : > { %v844_v61 = vpop.permute.xlu1 %843  ;;  %v858_v62 = vpop.permute.xlu0 %857 }
 0x1e4   : > { %v848_v1 = vadd.f32 %v844_v61, %v834_v40  ;;  %v906_v2 = vpop.permute.xlu2 %905  ;;  %v1256_v40 = vmul.f32 %v1254_v27, %v2359_v31  ;;  %v2749_v31 = vld [vmem:[#allocation2 + $0x1b] sm:$0xff] }
 0x1e5   : > { %v1297_v54 = vmul.f32 %v2749_v31, %v1296_v53  ;;  %v1283_v63 = vmul.f32 %v2749_v31, %v1282_v55  ;;  %v1269_v61 = vmul.f32 %v2749_v31, %v1268_v44 }
 0x1e6   : > { %v862_v7 = vadd.f32 %v858_v62, %v848_v1 }
 0x1e8   : > { %v870_v9 = vadd.f32 %v868_v0, %v862_v7  ;;  %v1310_v0 = vstv %s2747_s21  ;;  %v2762_v7 = vld [vmem:[#allocation2 + $0x23] sm:$0xff]  ;;  %s2827_s21 = sld [smem:[#allocation10 + $0x57]] }
 0x1e9   : > { %1209 = vrot.lane.b32.xlu0 %v1205_v8, %s2113_s27  ;;  %1195 = vrot.lane.b32.xlu1 %v1191_v39, %s2114_s28  ;;  %v1312_v8 = vmul.f32 %v2762_v7, %v1310_v0  ;;  %v1298_v39 = vmul.f32 %v2762_v7, %v1296_v53 }
 0x1ea   : > { %v884_v11 = vadd.f32 %v880_v50, %v870_v9  ;;  %1181 = vrot.lane.b32.xlu2 %v1177_v10, %s2112_s2  ;;  %v1284_v9 = vmul.f32 %v2762_v7, %v1282_v55 }
 0x1eb   : > { %v878_v15 = vpop.permute.xlu1 %877  ;;  %v892_v5 = vpop.permute.xlu0 %891 }
 0x1ec   : > { %v883_v14 = vadd.f32 %v878_v15, %v869_v60  ;;  %v922_v16 = vpop.permute.xlu2 %921 }
 0x1ee   : > { %v897_v18 = vadd.f32 %v892_v5, %v883_v14 }
 0x1f0   : > { %v911_v23 = vadd.f32 %v906_v2, %v897_v18  ;;  %v1332_v18 = vstv %s2759_s22  ;;  %s2839_s22 = sld [smem:[#allocation10 + $0x59]] }
 0x1f1   : > { %1225 = vrot.lane.b32.xlu0 %v1220_v43, %s2115_s8  ;;  %1211 = vrot.lane.b32.xlu1 %v1206_v20, %s2113_s27 }
 0x1f2   : > { %1197 = vrot.lane.b32.xlu2 %v1192_v24, %s2114_s28  ;;  %v1311_v24 = vmul.f32 %v2749_v31, %v1310_v0  ;;  %v1424_v0 = vstv %s2812_s29  ;;  %s2890_s29 = sld [smem:[#allocation10 + $0x60]] }
 0x1f3   : > { %v894_v12 = vpop.permute.xlu1 %893  ;;  %v908_v19 = vpop.permute.xlu0 %907 }
 0x1f4   : > { %v898_v25 = vadd.f32 %v894_v12, %v884_v11  ;;  %v948_v26 = vpop.permute.xlu2 %947 }
 0x1f6   : > { %v912_v30 = vadd.f32 %v908_v19, %v898_v25 }
 0x1f8   : > { %v926_v34 = vadd.f32 %v922_v16, %v912_v30  ;;  %v2770_v16 = vld [vmem:[#allocation2 + $0x1c] sm:$0xff]  ;;  %v1050_v30 = vstv %s2774_s24  ;;  %s2853_s24 = sld [smem:[#allocation10 + $0x5a]] }
 0x1f9   : > { %1259 = vrot.lane.b32.xlu0 %v1255_v32, %s2110_s6  ;;  %1245 = vrot.lane.b32.xlu1 %v1241_v33, %s2111_s11  ;;  %v1347_v20 = vmul.f32 %v1346_v17, %v2770_v16  ;;  %v1360_v33 = vstv %s2776_s30  ;;  %s2861_s30 = sld [smem:[#allocation10 + $0x5c]] }
 0x1fa   : > { %1223 = vrot.lane.b32.xlu2 %v1219_v29, %s2115_s8  ;;  %v1348_v29 = vmul.f32 %v1346_v17, %v2786_v28 }
 0x1fb   : > { %v920_v35 = vpop.permute.xlu1 %919  ;;  %v934_v36 = vpop.permute.xlu0 %933 }
 0x1fc   : > { %v925_v38 = vadd.f32 %v920_v35, %v911_v23  ;;  %v972_v41 = vpop.permute.xlu2 %971  ;;  %v1333_v23 = vmul.f32 %v1332_v18, %v2770_v16 }
 0x1fe   : > { %v939_v22 = vadd.f32 %v934_v36, %v925_v38  ;;  %v1334_v36 = vmul.f32 %v1332_v18, %v2786_v28  ;;  %v1051_v38 = vmul.f32 %v1050_v30, %v2617_v47  ;;  %v2837_v18 = vld [vmem:[#allocation2 + $0x25] sm:$0xff] }
 0x200   : > { %v953_v45 = vadd.f32 %v948_v26, %v939_v22 }
 0x201   : > { %1275 = vrot.lane.b32.xlu0 %v1270_v13, %s2112_s2  ;;  %1261 = vrot.lane.b32.xlu1 %v1256_v40, %s2110_s6  ;;  %v1388_v40 = vstv %s2784_s4  ;;  %s2863_s4 = sld [smem:[#allocation10 + $0x5d]] }
 0x202   : > { %1247 = vrot.lane.b32.xlu2 %v1242_v46, %s2111_s11  ;;  %v961_v49 = vadd.f32 %v959_v48, %v953_v45  ;;  %v1374_v45 = vstv %s2788_s12  ;;  %v1052_v46 = vmul.f32 %v1050_v30, %v2633_v59  ;;  %v1389_v47 = vmul.f32 %v1388_v40, %v2770_v16  ;;  %s2876_s12 = sld [smem:[#allocation10 + $0x46]] }
 0x203   : > { %v936_v50 = vpop.permute.xlu1 %935  ;;  %v950_v57 = vpop.permute.xlu0 %949 }
 0x204   : > { %v940_v21 = vadd.f32 %v936_v50, %v926_v34  ;;  %v998_v52 = vpop.permute.xlu2 %997  ;;  %v1362_v34 = vmul.f32 %v1360_v33, %v2786_v28 }
 0x206   : > { %v954_v58 = vadd.f32 %v950_v57, %v940_v21  ;;  %v1361_v57 = vmul.f32 %v1360_v33, %v2770_v16 }
 0x208   : > { %v962_v60 = vadd.f32 %v960_v56, %v954_v58  ;;  %v1402_v58 = vstv %s2802_s13  ;;  %s2878_s13 = sld [smem:[#allocation10 + $0x5e]] }
 0x209   : > { %1301 = vrot.lane.b32.xlu0 %v1297_v54, %s2113_s27  ;;  %1287 = vrot.lane.b32.xlu1 %v1283_v63, %s2114_s28  ;;  %v1404_v54 = vmul.f32 %v1402_v58, %v2786_v28  ;;  %v1390_v63 = vmul.f32 %v1388_v40, %v2786_v28 }
 0x20a   : > { %1273 = vrot.lane.b32.xlu2 %v1269_v61, %s2112_s2  ;;  %v976_v4 = vadd.f32 %v972_v41, %v962_v60  ;;  %v1376_v60 = vmul.f32 %v1374_v45, %v2786_v28 }
 0x20b   : > { %v970_v62 = vpop.permute.xlu1 %969  ;;  %v984_v1 = vpop.permute.xlu0 %983 }
 0x20c   : > { %v975_v2 = vadd.f32 %v970_v62, %v961_v49  ;;  %v1014_v3 = vpop.permute.xlu2 %1013  ;;  %v1375_v49 = vmul.f32 %v1374_v45, %v2770_v16 }
 0x20e   : > { %v989_v6 = vadd.f32 %v984_v1, %v975_v2 }
 0x210   : > { %v1003_v10 = vadd.f32 %v998_v52, %v989_v6  ;;  %v1438_v6 = vstv %s2810_s20  ;;  %s2886_s20 = sld [smem:[#allocation10 + $0x5f]] }
 0x211   : > { %1317 = vrot.lane.b32.xlu0 %v1312_v8, %s2115_s8  ;;  %1303 = vrot.lane.b32.xlu1 %v1298_v39, %s2113_s27 }
 0x212   : > { %1289 = vrot.lane.b32.xlu2 %v1284_v9, %s2114_s28 }
 0x213   : > { %v986_v11 = vpop.permute.xlu1 %985  ;;  %v1000_v15 = vpop.permute.xlu0 %999 }
 0x214   : > { %v990_v5 = vadd.f32 %v986_v11, %v976_v4  ;;  %v1040_v14 = vpop.permute.xlu2 %1039 }
 0x216   : > { %v1004_v43 = vadd.f32 %v1000_v15, %v990_v5 }
 0x218   : > { %v1018_v12 = vadd.f32 %v1014_v3, %v1004_v43  ;;  %v2821_v3 = vld [vmem:[#allocation2 + $0x1d] sm:$0xff]  ;;  %v1142_v43 = vstv %s2825_s7  ;;  %s1865_s7 = sld [smem:[#allocation10 + $0x61]] }
 0x219   : > { %1351 = vrot.lane.b32.xlu0 %v1347_v20, %s2110_s6  ;;  %1337 = vrot.lane.b32.xlu1 %v1333_v23, %s2111_s11  ;;  %v1439_v39 = vmul.f32 %v1438_v6, %v2821_v3  ;;  %v1425_v9 = vmul.f32 %v1424_v0, %v2821_v3  ;;  %v1452_v23 = vstv %s2827_s21 }
 0x21a   : > { %1315 = vrot.lane.b32.xlu2 %v1311_v24, %s2115_s8  ;;  %v1440_v24 = vmul.f32 %v1438_v6, %v2837_v18 }
 0x21b   : > { %v1012_v19 = vpop.permute.xlu1 %1011  ;;  %v1026_v25 = vpop.permute.xlu0 %1025 }
 0x21c   : > { %v1017_v26 = vadd.f32 %v1012_v19, %v1003_v10  ;;  %v1064_v27 = vpop.permute.xlu2 %1063  ;;  %v1403_v10 = vmul.f32 %v1402_v58, %v2770_v16  ;;  %v1530_v58 = vstv %s2863_s4 }
 0x21e   : > { %v1031_v32 = vadd.f32 %v1026_v25, %v1017_v26  ;;  %v1426_v25 = vmul.f32 %v1424_v0, %v2837_v18  ;;  %v1143_v26 = vmul.f32 %v1142_v43, %v2668_v37  ;;  %v2888_v0 = vld [vmem:[#allocation2 + $0x26] sm:$0xff] }
 0x220   : > { %v1045_v35 = vadd.f32 %v1040_v14, %v1031_v32 }
 0x221   : > { %1367 = vrot.lane.b32.xlu0 %v1362_v34, %s2112_s2  ;;  %1353 = vrot.lane.b32.xlu1 %v1348_v29, %s2110_s6  ;;  %v1466_v29 = vstv %s2835_s10 }
 0x222   : > { %1339 = vrot.lane.b32.xlu2 %v1334_v36, %s2111_s11  ;;  %v1053_v41 = vadd.f32 %v1051_v38, %v1045_v35  ;;  %v1480_v35 = vstv %s2839_s22  ;;  %v1144_v36 = vmul.f32 %v1142_v43, %v2684_v51  ;;  %v1467_v37 = vmul.f32 %v1466_v29, %v2821_v3 }
 0x223   : > { %v1028_v42 = vpop.permute.xlu1 %1027  ;;  %v1042_v22 = vpop.permute.xlu0 %1041 }
 0x224   : > { %v1032_v44 = vadd.f32 %v1028_v42, %v1018_v12  ;;  %v1090_v13 = vpop.permute.xlu2 %1089  ;;  %v1454_v12 = vmul.f32 %v1452_v23, %v2837_v18 }
 0x226   : > { %v1046_v48 = vadd.f32 %v1042_v22, %v1032_v44  ;;  %v1453_v22 = vmul.f32 %v1452_v23, %v2821_v3 }
 0x228   : > { %v1054_v50 = vadd.f32 %v1052_v46, %v1046_v48  ;;  %v1494_v48 = vstv %s2853_s24 }
 0x229   : > { %1393 = vrot.lane.b32.xlu0 %v1389_v47, %s2113_s27  ;;  %1379 = vrot.lane.b32.xlu1 %v1375_v49, %s2114_s28  ;;  %v1482_v47 = vmul.f32 %v1480_v35, %v2837_v18  ;;  %v1496_v49 = vmul.f32 %v1494_v48, %v2837_v18 }
 0x22a   : > { %1365 = vrot.lane.b32.xlu2 %v1361_v57, %s2112_s2  ;;  %v1068_v21 = vadd.f32 %v1064_v27, %v1054_v50  ;;  %v1468_v50 = vmul.f32 %v1466_v29, %v2837_v18 }
 0x22b   : > { %v1062_v52 = vpop.permute.xlu1 %1061  ;;  %v1076_v59 = vpop.permute.xlu0 %1075 }
 0x22c   : > { %v1067_v53 = vadd.f32 %v1062_v52, %v1053_v41  ;;  %v1106_v55 = vpop.permute.xlu2 %1105  ;;  %v1481_v41 = vmul.f32 %v1480_v35, %v2821_v3 }
 0x22e   : > { %v1081_v56 = vadd.f32 %v1076_v59, %v1067_v53 }
 0x230   : > { %v1095_v61 = vadd.f32 %v1090_v13, %v1081_v56  ;;  %v1516_v56 = vstv %s2861_s30  ;;  %s1640_s30 = scalar_lea.sflag [#allocation8], %s2242_s9 }
 0x231   : > { %1409 = vrot.lane.b32.xlu0 %v1404_v54, %s2115_s8  ;;  %1395 = vrot.lane.b32.xlu1 %v1390_v63, %s2113_s27 }
 0x232   : > { %1381 = vrot.lane.b32.xlu2 %v1376_v60, %s2114_s28 }
 0x233   : > { %v1078_v4 = vpop.permute.xlu1 %1077  ;;  %v1092_v62 = vpop.permute.xlu0 %1091 }
 0x234   : > { %v1082_v1 = vadd.f32 %v1078_v4, %v1068_v21  ;;  %v1132_v2 = vpop.permute.xlu2 %1131 }
 0x236   : > { %v1096_v8 = vadd.f32 %v1092_v62, %v1082_v1 }
 0x238   : > { %v1110_v11 = vadd.f32 %v1106_v55, %v1096_v8  ;;  %v2872_v55 = vld [vmem:[#allocation2 + $0x1e] sm:$0xff]  ;;  %v1234_v8 = vstv %s2876_s12 }
 0x239   : > { %1443 = vrot.lane.b32.xlu0 %v1439_v39, %s2110_s6  ;;  %1429 = vrot.lane.b32.xlu1 %v1425_v9, %s2111_s11  ;;  %v1517_v63 = vmul.f32 %v1516_v56, %v2872_v55  ;;  %v1531_v60 = vmul.f32 %v1530_v58, %v2872_v55  ;;  %v1544_v9 = vstv %s2878_s13 }
 0x23a   : > { %1407 = vrot.lane.b32.xlu2 %v1403_v10, %s2115_s8  ;;  %v1532_v10 = vmul.f32 %v1530_v58, %v2888_v0 }
 0x23b   : > { %v1104_v15 = vpop.permute.xlu1 %1103  ;;  %v1118_v5 = vpop.permute.xlu0 %1117 }
 0x23c   : > { %v1109_v14 = vadd.f32 %v1104_v15, %v1095_v61  ;;  %v1156_v17 = vpop.permute.xlu2 %1155  ;;  %v1495_v61 = vmul.f32 %v1494_v48, %v2821_v3 }
 0x23e   : > { %v1123_v20 = vadd.f32 %v1118_v5, %v1109_v14  ;;  %v1518_v5 = vmul.f32 %v1516_v56, %v2888_v0  ;;  %v1235_v14 = vmul.f32 %v2749_v31, %v1234_v8 }
 0x240   : > { %v1137_v19 = vadd.f32 %v1132_v2, %v1123_v20 }
 0x241   : > { %1445 = vrot.lane.b32.xlu1 %v1440_v24, %s2110_s6  ;;  %1459 = vrot.lane.b32.xlu0 %v1454_v12, %s2112_s2  ;;  %v1558_v12 = vstv %s2886_s20 }
 0x242   : > { %1431 = vrot.lane.b32.xlu2 %v1426_v25, %s2111_s11  ;;  %v1145_v27 = vadd.f32 %v1143_v26, %v1137_v19  ;;  %v1572_v19 = vstv %s2890_s29  ;;  %v1236_v25 = vmul.f32 %v2762_v7, %v1234_v8  ;;  %s2036_s29 = scalar_lea.hbm %s2968_s3, 32 }
 0x243   : > { %v1120_v30 = vpop.permute.xlu1 %1119  ;;  %v1134_v32 = vpop.permute.xlu0 %1133  ;;  %v1573_v31 = vmul.f32 %v1572_v19, %v2872_v55 }
 0x244   : > { %v1124_v33 = vadd.f32 %v1120_v30, %v1110_v11  ;;  %v1182_v34 = vpop.permute.xlu2 %1181  ;;  %v1546_v11 = vmul.f32 %v1544_v9, %v2888_v0 }
 0x246   : > { %v1138_v38 = vadd.f32 %v1134_v32, %v1124_v33  ;;  %v1545_v32 = vmul.f32 %v1544_v9, %v2872_v55 }
 0x248   : > { %v1146_v42 = vadd.f32 %v1144_v36, %v1138_v38  ;;  %v1586_v38 = vstv %s1865_s7 }
 0x249   : > { %1471 = vrot.lane.b32.xlu1 %v1467_v37, %s2114_s28  ;;  %1485 = vrot.lane.b32.xlu0 %v1481_v41, %s2113_s27  ;;  %v1574_v37 = vmul.f32 %v1572_v19, %v2888_v0  ;;  %v1588_v41 = vmul.f32 %v1586_v38, %v2888_v0 }
 0x24a   : > { %1457 = vrot.lane.b32.xlu2 %v1453_v22, %s2112_s2  ;;  %v1160_v44 = vadd.f32 %v1156_v17, %v1146_v42  ;;  %v1560_v42 = vmul.f32 %v1558_v12, %v2888_v0 }
 0x24b   : > { %v1154_v13 = vpop.permute.xlu1 %1153  ;;  %v1168_v51 = vpop.permute.xlu0 %1167 }
 0x24c   : > { %v1159_v40 = vadd.f32 %v1154_v13, %v1145_v27  ;;  %v1198_v45 = vpop.permute.xlu2 %1197  ;;  %v1559_v27 = vmul.f32 %v1558_v12, %v2872_v55 }
 0x24e   : > { %v1173_v46 = vadd.f32 %v1168_v51, %v1159_v40 }
 0x250   : > { %v1187_v57 = vadd.f32 %v1182_v34, %v1173_v46  ;;  %v1587_v46 = vmul.f32 %v1586_v38, %v2872_v55 }
 0x251   : > { %1487 = vrot.lane.b32.xlu1 %v1482_v47, %s2113_s27  ;;  %1501 = vrot.lane.b32.xlu0 %v1496_v49, %s2115_s8 }
 0x252   : > { %1473 = vrot.lane.b32.xlu2 %v1468_v50, %s2114_s28 }
 0x253   : > { %v1170_v21 = vpop.permute.xlu1 %1169  ;;  %v1184_v52 = vpop.permute.xlu0 %1183 }
 0x254   : > { %v1174_v59 = vadd.f32 %v1170_v21, %v1160_v44  ;;  %v1224_v53 = vpop.permute.xlu2 %1223 }
 0x256   : > { %v1188_v54 = vadd.f32 %v1184_v52, %v1174_v59 }
 0x258   : > { %v1202_v4 = vadd.f32 %v1198_v45, %v1188_v54 }
 0x259   : > { %1521 = vrot.lane.b32.xlu1 %v1517_v63, %s2111_s11  ;;  %1535 = vrot.lane.b32.xlu0 %v1531_v60, %s2110_s6 }
 0x25a   : > { %1499 = vrot.lane.b32.xlu2 %v1495_v61, %s2115_s8 }
 0x25b   : > { %v1196_v62 = vpop.permute.xlu1 %1195  ;;  %v1210_v1 = vpop.permute.xlu0 %1209 }
 0x25c   : > { %v1201_v2 = vadd.f32 %v1196_v62, %v1187_v57  ;;  %v1248_v6 = vpop.permute.xlu2 %1247 }
 0x25e   : > { %v1215_v39 = vadd.f32 %v1210_v1, %v1201_v2 }
 0x260   : > { %v1229_v15 = vadd.f32 %v1224_v53, %v1215_v39 }
 0x261   : > { %1537 = vrot.lane.b32.xlu1 %v1532_v10, %s2110_s6  ;;  %1551 = vrot.lane.b32.xlu0 %v1546_v11, %s2112_s2  ;;  %s1845_s6 = sld [smem:[#allocation10 + $0x4d]] }
 0x262   : > { %1523 = vrot.lane.b32.xlu2 %v1518_v5, %s2111_s11  ;;  %v1237_v17 = vadd.f32 %v1235_v14, %v1229_v15  ;;  %s1852_s11 = sld [smem:[#allocation10 + $0x54]] }
 0x263   : > { %v1212_v43 = vpop.permute.xlu1 %1211  ;;  %v1226_v20 = vpop.permute.xlu0 %1225 }
 0x264   : > { %v1216_v23 = vadd.f32 %v1212_v43, %v1202_v4  ;;  %v1274_v24 = vpop.permute.xlu2 %1273 }
 0x266   : > { %v1230_v26 = vadd.f32 %v1226_v20, %v1216_v23 }
 0x267   : > { %v1326_v21 = vstv %s1845_s6 }
 0x268   : > { %v1238_v30 = vadd.f32 %v1236_v25, %v1230_v26  ;;  %v1327_v53 = vmul.f32 %v1326_v21, %v2770_v16  ;;  %v1328_v61 = vmul.f32 %v1326_v21, %v2786_v28  ;;  %v1418_v23 = vstv %s1852_s11 }
 0x269   : > { %1563 = vrot.lane.b32.xlu1 %v1559_v27, %s2114_s28  ;;  %1577 = vrot.lane.b32.xlu0 %v1573_v31, %s2113_s27  ;;  %v1419_v19 = vmul.f32 %v1418_v23, %v2821_v3 }
 0x26a   : > { %1549 = vrot.lane.b32.xlu2 %v1545_v32, %s2112_s2  ;;  %v1252_v33 = vadd.f32 %v1248_v6, %v1238_v30  ;;  %s1859_s2 = sld [smem:[#allocation10 + $0x5b]] }
 0x26b   : > { %v1246_v34 = vpop.permute.xlu1 %1245  ;;  %v1260_v29 = vpop.permute.xlu0 %1259 }
 0x26c   : > { %v1251_v35 = vadd.f32 %v1246_v34, %v1237_v17  ;;  %v1290_v7 = vpop.permute.xlu2 %1289 }
 0x26e   : > { %v1265_v36 = vadd.f32 %v1260_v29, %v1251_v35 }
 0x270   : > { %v1279_v22 = vadd.f32 %v1274_v24, %v1265_v36 }
 0x271   : > { %1579 = vrot.lane.b32.xlu1 %v1574_v37, %s2113_s27  ;;  %1593 = vrot.lane.b32.xlu0 %v1588_v41, %s2115_s8  ;;  %s1762_s27 = sshll.u32 %s2242_s9, 4 }
 0x272   : > { %1565 = vrot.lane.b32.xlu2 %v1560_v42, %s2114_s28  ;;  %s1874_s28 = sshll.u32 %s2094_s17, 4  ;;  %s222_s17 = scalar_lea.vmem [#allocation11], %s1762_s27 }
 0x273   : > { %v1262_v44 = vpop.permute.xlu1 %1261  ;;  %v1276_v13 = vpop.permute.xlu0 %1275  ;;  %s1651_s10 = scalar_lea.hbm %s2968_s3, %s1874_s28  ;;  %s1652_s22 = sshll.u32 %s222_s17, 4  ;;  %s1653_s22 = int_to_ptr.vmem [resolvable:$true] %s1652_s22 }
 0x274   : > { %v1266_v51 = vadd.f32 %v1262_v44, %v1252_v33  ;;  %v1316_v40 = vpop.permute.xlu2 %1315  ;;  %v1420_v33 = vmul.f32 %v1418_v23, %v2837_v18  ;;  %s1654_s24 = sshll.u32 %s1651_s10, 4  ;;  %s1655_s24 = int_to_ptr.hbm [resolvable:$true] %s1654_s24 }
 0x275   : > { %s2030_s4 = sshra.s32 %s1655_s24, 4  ;;  %s2031_s4 = int_to_ptr.hbm [resolvable:$true] %s2030_s4 }
 0x276   : > { %v1280_v45 = vadd.f32 %v1276_v13, %v1266_v51  ;;  %s2032_s12 = scalar_lea.hbm %s2031_s4, 16  ;;  %p2037_p11 = scmp.lt.s32.totalorder %s2031_s4, %s2968_s3 }
 0x277   : > { %p2033_p3 = scmp.ne.s32.totalorder %s2031_s4, %s2032_s12  ;;  %p2038_p12 = scmp.lt.s32.totalorder %s2036_s29, %s2032_s12 }
 0x278   : > { %v1294_v48 = vadd.f32 %v1290_v7, %v1280_v45 }
 0x279   : > { %p2034_p5 = pnand %p2033_p3, %p2193_p8  ;;  %p2039_p0 = por %p2038_p12, %p2037_p11 }
 0x27a   : > { %1591 = vrot.lane.b32.xlu2 %v1587_v46, %s2115_s8  ;;  %v1510_v46 = vstv %s1859_s2 }
 0x27b   : > { %v1288_v47 = vpop.permute.xlu1 %1287  ;;  %v1302_v49 = vpop.permute.xlu0 %1301  ;;  %p2035_p7 = pneg %p2034_p5 }
 0x27c   : > { %v1293_v50 = vadd.f32 %v1288_v47, %v1279_v22  ;;  %v1340_v57 = vpop.permute.xlu2 %1339 }
 0x27d   : > { %p2040_p1 = pnand %p2039_p0, %p2035_p7 }
 0x27e   : > { %v1307_v52 = vadd.f32 %v1302_v49, %v1293_v50  ;;  %v1511_v50 = vmul.f32 %v1510_v46, %v2872_v55 }
 0x280   : > { %v1321_v59 = vadd.f32 %v1316_v40, %v1307_v52 }
 0x282   : > { %v1329_v56 = vadd.f32 %v1327_v53, %v1321_v59 }
 0x283   : > { %v1304_v58 = vpop.permute.xlu1 %1303  ;;  %v1318_v54 = vpop.permute.xlu0 %1317 }
 0x284   : > { %v1308_v63 = vadd.f32 %v1304_v58, %v1294_v48  ;;  %v1366_v60 = vpop.permute.xlu2 %1365 }
 0x286   : > { %v1322_v4 = vadd.f32 %v1318_v54, %v1308_v63 }
 0x288   : > { %v1330_v62 = vadd.f32 %v1328_v61, %v1322_v4 }
 0x28a   : > { %v1344_v15 = vadd.f32 %v1340_v57, %v1330_v62 }
 0x28b   : > { %v1338_v1 = vpop.permute.xlu1 %1337  ;;  %v1352_v2 = vpop.permute.xlu0 %1351 }
 0x28c   : > { %v1382_v6 = vpop.permute.xlu2 %1381  ;;  %v1343_v8 = vadd.f32 %v1338_v1, %v1329_v56  ;;  %v1512_v56 = vmul.f32 %v1510_v46, %v2888_v0 }
 0x28e   : > { %v1357_v11 = vadd.f32 %v1352_v2, %v1343_v8 }
 0x290   : > { %v1371_v5 = vadd.f32 %v1366_v60, %v1357_v11 }
 0x293   : > { %v1354_v39 = vpop.permute.xlu1 %1353  ;;  %v1368_v9 = vpop.permute.xlu0 %1367 }
 0x294   : > { %v1408_v10 = vpop.permute.xlu2 %1407  ;;  %v1358_v16 = vadd.f32 %v1354_v39, %v1344_v15 }
 0x296   : > { %v1372_v28 = vadd.f32 %v1368_v9, %v1358_v16 }
 0x298   : > { %v1386_v25 = vadd.f32 %v1382_v6, %v1372_v28 }
 0x29b   : > { %v1380_v14 = vpop.permute.xlu1 %1379  ;;  %v1394_v17 = vpop.permute.xlu0 %1393 }
 0x29c   : > { %v1385_v43 = vadd.f32 %v1380_v14, %v1371_v5  ;;  %v1432_v20 = vpop.permute.xlu2 %1431 }
 0x29e   : > { %v1399_v24 = vadd.f32 %v1394_v17, %v1385_v43 }
 0x2a0   : > { %v1413_v12 = vadd.f32 %v1408_v10, %v1399_v24 }
 0x2a2   : > { %v1421_v26 = vadd.f32 %v1419_v19, %v1413_v12 }
 0x2a3   : > { %v1396_v27 = vpop.permute.xlu1 %1395  ;;  %v1410_v31 = vpop.permute.xlu0 %1409 }
 0x2a4   : > { %v1400_v30 = vadd.f32 %v1396_v27, %v1386_v25  ;;  %v1458_v32 = vpop.permute.xlu2 %1457 }
 0x2a6   : > { %v1414_v34 = vadd.f32 %v1410_v31, %v1400_v30 }
 0x2a8   : > { %v1422_v29 = vadd.f32 %v1420_v33, %v1414_v34 }
 0x2aa   : > { %v1436_v3 = vadd.f32 %v1432_v20, %v1422_v29 }
 0x2ab   : > { %v1430_v35 = vpop.permute.xlu1 %1429  ;;  %v1444_v7 = vpop.permute.xlu0 %1443 }
 0x2ac   : > { %v1474_v36 = vpop.permute.xlu2 %1473  ;;  %v1435_v38 = vadd.f32 %v1430_v35, %v1421_v26 }
 0x2ae   : > { %v1449_v42 = vadd.f32 %v1444_v7, %v1435_v38 }
 0x2b0   : > { %v1463_v13 = vadd.f32 %v1458_v32, %v1449_v42 }
 0x2b3   : > { %v1446_v37 = vpop.permute.xlu1 %1445  ;;  %v1460_v41 = vpop.permute.xlu0 %1459 }
 0x2b4   : > { %v1500_v22 = vpop.permute.xlu2 %1499  ;;  %v1450_v44 = vadd.f32 %v1446_v37, %v1436_v3 }
 0x2b6   : > { %v1464_v48 = vadd.f32 %v1460_v41, %v1450_v44 }
 0x2b8   : > { %v1478_v57 = vadd.f32 %v1474_v36, %v1464_v48 }
 0x2bb   : > { %v1472_v51 = vpop.permute.xlu1 %1471  ;;  %v1486_v40 = vpop.permute.xlu0 %1485 }
 0x2bc   : > { %v1477_v45 = vadd.f32 %v1472_v51, %v1463_v13  ;;  %v1524_v47 = vpop.permute.xlu2 %1523 }
 0x2be   : > { %v1491_v18 = vadd.f32 %v1486_v40, %v1477_v45 }
 0x2c0   : > { %v1505_v49 = vadd.f32 %v1500_v22, %v1491_v18 }
 0x2c2   : > { %v1513_v21 = vadd.f32 %v1511_v50, %v1505_v49 }
 0x2c3   : > { %v1488_v52 = vpop.permute.xlu1 %1487  ;;  %v1502_v59 = vpop.permute.xlu0 %1501 }
 0x2c4   : > { %v1492_v53 = vadd.f32 %v1488_v52, %v1478_v57  ;;  %v1550_v63 = vpop.permute.xlu2 %1549 }
 0x2c6   : > { %v1506_v58 = vadd.f32 %v1502_v59, %v1492_v53 }
 0x2c8   : > { %v1514_v54 = vadd.f32 %v1512_v56, %v1506_v58 }
 0x2ca   : > { %v1528_v8 = vadd.f32 %v1524_v47, %v1514_v54 }
 0x2cb   : > { %v1522_v60 = vpop.permute.xlu1 %1521  ;;  %v1536_v61 = vpop.permute.xlu0 %1535 }
 0x2cc   : > { %v1527_v4 = vadd.f32 %v1522_v60, %v1513_v21  ;;  %v1566_v2 = vpop.permute.xlu2 %1565 }
 0x2ce   : > { %v1541_v6 = vadd.f32 %v1536_v61, %v1527_v4 }
 0x2d0   : > { %v1555_v55 = vadd.f32 %v1550_v63, %v1541_v6 }
 0x2d3   : > { %v1538_v62 = vpop.permute.xlu1 %1537  ;;  %v1552_v1 = vpop.permute.xlu0 %1551 }
 0x2d4   : > { %v1542_v39 = vadd.f32 %v1538_v62, %v1528_v8  ;;  %v1592_v5 = vpop.permute.xlu2 %1591 }
 0x2d6   : > { %v1556_v15 = vadd.f32 %v1552_v1, %v1542_v39 }
 0x2d8   : > { %v1570_v17 = vadd.f32 %v1566_v2, %v1556_v15 }
 0x2db   : > { %v1564_v9 = vpop.permute.xlu1 %1563  ;;  %v1578_v10 = vpop.permute.xlu0 %1577 }
 0x2dc   : > { %v1569_v11 = vadd.f32 %v1564_v9, %v1555_v55 }
 0x2de   : > { %v1583_v16 = vadd.f32 %v1578_v10, %v1569_v11 }
 0x2e0   : > { %v1597_v0 = vadd.f32 %v1592_v5, %v1583_v16 }
 0x2e2   : > { %v1866_v14 = vmul.f32 -1.442695, %v1597_v0 }
 0x2e3   : > { %v1580_v43 = vpop.permute.xlu1 %1579  ;;  %v1594_v23 = vpop.permute.xlu0 %1593 }
 0x2e4   : > { %1961 = vpow2.f32 %v1866_v14  ;;  %v1584_v20 = vadd.f32 %v1580_v43, %v1570_v17 }
 0x2e6   : > { %v1598_v28 = vadd.f32 %v1594_v23, %v1584_v20 }
 0x2e8   : > { %v1867_v24 = vmul.f32 -1.442695, %v1598_v28 }
 0x2ea   : > { %v1962_v12 = vpop.eup %1961  ;;  %1963 = vpow2.f32 %v1867_v24 }
 0x2eb   : > { %v1605_v19 = vadd.f32 1.0, %v1962_v12 }
 0x2ed   : > { %1965 = vrcp.f32 %v1605_v19  ;;  %v1618_v32 = vand.u32 2147483648, %v1605_v19  ;;  %v1616_v34 = vand.u32 2147483647, %v1605_v19  ;;  %vm1612_vm4 = vweird.f32 %v1605_v19 }
 0x2ef   : > { %v1619_v36 = vor.u32 1.1754944e-38, %v1618_v32  ;;  %vm1617_vm6 = vcmp.eq.f32.partialorder %v1616_v34, 8.507059e+37 }
 0x2f0   : > { %v1964_v25 = vpop.eup %1963 }
 0x2f1   : > { %v1606_v26 = vadd.f32 1.0, %v1964_v25 }
 0x2f3   : > { %v1966_v27 = vpop.eup %1965  ;;  %1967 = vrcp.f32 %v1606_v26  ;;  %v1633_v41 = vand.u32 2147483648, %v1606_v26  ;;  %v1631_v3 = vand.u32 2147483647, %v1606_v26  ;;  %vm1627_vm8 = vweird.f32 %v1606_v26 }
 0x2f4   : > { %v1608_v31 = vmul.f32 %v1966_v27, %v1605_v19  ;;  %vm1613_vm3 = vweird.f32 %v1966_v27 }
 0x2f5   : > { %vm1614_vm5 = vmor %vm1612_vm4, %vm1613_vm3  ;;  %v1634_v13 = vor.u32 1.1754944e-38, %v1633_v41  ;;  %vm1632_vm10 = vcmp.eq.f32.partialorder %v1631_v3, 8.507059e+37 }
 0x2f6   : > { %v1609_v30 = vsub.f32 1.0, %v1608_v31 }
 0x2f8   : > { %v1610_v33 = vmul.f32 %v1966_v27, %v1609_v30 }
 0x2f9   : > { %v1968_v29 = vpop.eup %1967 }
 0x2fa   : > { %v1623_v35 = vmul.f32 %v1968_v29, %v1606_v26  ;;  %v1611_v7 = vadd.f32 %v1966_v27, %v1610_v33  ;;  %vm1628_vm7 = vweird.f32 %v1968_v29 }
 0x2fb   : > { %vm1629_vm9 = vmor %vm1627_vm8, %vm1628_vm7 }
 0x2fc   : > { %v1624_v38 = vsub.f32 1.0, %v1623_v35  ;;  %v1615_v37 = vsel %vm1614_vm5, %v1966_v27, %v1611_v7 }
 0x2fd   : > { %v1620_v42 = vsel %vm1617_vm6, %v1619_v36, %v1615_v37 }
 0x2fe   : > { %v1625_v22 = vmul.f32 %v1968_v29, %v1624_v38  ;;  %1637 = vst.msk [vmem:[%s222_s17] sm:$0xff] %vm228_vm0, %v1620_v42 }
 0x300   : > { %v1626_v44 = vadd.f32 %v1968_v29, %v1625_v22 }
 0x302   : > { %v1630_v51 = vsel %vm1629_vm9, %v1968_v29, %v1626_v44 }
 0x303   : > { %v1635_v40 = vsel %vm1632_vm10, %v1634_v13, %v1630_v51 }
 0x304   : > { %1638 = vst.msk [vmem:[%s222_s17 + $0x8] sm:$0xff] %vm228_vm0, %v1635_v40 }
 0x305   : > { %2043 = shalt.err (!%p2040_p1)
}
 0x306   : > { %s2116_s9 = smov 128   ;;  %s2117_s11 = smov 8  }
 0x307   : > { %1881 = dma.vmem_to_hbm [thread:$0]  (%p2193_p8), %s1653_s22, 256, %s1655_s24, %s1640_s30, %s2116_s9, %s2116_s9, %s2117_s11  }
 0x308 PF: > { %s1669_s2 = sand.u32 1, %s2082_s14   ;;  %p1892_p2 = pnand %p1755_p13, %p2197_p9 }
 0x309   : > { %s1670_s27 = scalar_lea.sflag [#allocation8], %s1669_s2 }
 0x30a   : > { %p1893_p4 = pneg %p1892_p2 }
 0x30c   : > { %2077 = dma.done.wait (%p1893_p4), %s1670_s27, 256  }
 0x30d   : > { %2079 = vsyncadd (%p1893_p4), %s1670_s27, 4294967040  ;;  %s21_s19 = sadd.s32 1, %s2102_s19   ;;  %s2976_s14 = smov %s2086_s15 }
 0x30e   : > { %p18_p6 = scmp.ge.s32.totalorder %s21_s19, 4   ;;  %s2977_s15 = smov %s2090_s16 }
 0x30f   : > { %s2978_s16 = smov %s2235_s23  ;;  %s2979_s17 = smov %s2098_s18 }
 0x310   : > { %s2980_s18 = smov %s2982_s5  ;;  %20 = sbr.rel (!%p18_p6) target bundleno = 9 (0x9), region = 94 }
 0x315   :  { %1676 = vsyncpa [#allocation7], 1 }
 0x316   :  { %1678 = vsyncpa [#allocation7 + $0x1], 1 }
 0x317   :  { %1679 = vsyncpa [#allocation8], 1 }
 0x318   :  { %1681 = vsyncpa [#allocation8 + $0x1], 1 }
 0x319   :  { %1682 = vsyncpa [#allocation9], 1 }
 0x31a   :  { %1684 = vsyncpa [#allocation9 + $0x1], 1 }

</bundles_post_ra>
